<compile_context>
chip_gen: v7x
topology: tpu7x:2x2x1
jax: 0.10.0
libtpu: 0.0.40
codegen_flags: <defaults>
</compile_context>

<pallas_src>
import functools

import jax
import jax.numpy as jnp
from jax.experimental import pallas as pl
from jax.experimental.pallas import tpu as pltpu

H = 1024            # per-layer hidden size (module uses 1024 * 4 features)
NUM_LAYERS = 4      # last 4 hidden states are concatenated
FEAT = H * NUM_LAYERS
N_CLS = 5
N_REG = 20
N_PAD = 128         # fused/padded output lane width (lane-dense stores)


def _heads_kernel(h_ref, w_ref, b_ref, out_ref):
    # h_ref:   (NUM_LAYERS, tb, H)     CLS activations for this batch tile
    # w_ref:   (NUM_LAYERS, H, N_PAD)  fused per-layer weight slices (grid-invariant)
    # b_ref:   (1, N_PAD)              fused bias (grid-invariant)
    # out_ref: (tb, N_PAD)             fused head output (lane-dense)
    #
    # sum_l h[l] @ W[l]  ==  concat_l(h[l]) @ W  -- no lane-axis concat/relayout
    # in VMEM, 4 MXU calls, f32 accumulation.
    acc = jnp.dot(h_ref[0], w_ref[0], preferred_element_type=jnp.float32)
    for l in range(1, NUM_LAYERS):                      # static unroll
        acc += jnp.dot(h_ref[l], w_ref[l], preferred_element_type=jnp.float32)

    y = acc + b_ref[...]

    # Sigmoid only on the classifier columns (0:5); regressor columns pass through.
    col = jax.lax.broadcasted_iota(jnp.int32, y.shape, 1)
    out_ref[...] = jnp.where(col < N_CLS, jax.nn.sigmoid(y), y)


def prepare_fused_head_params(w_cls, b_cls, w_reg, b_reg):
    """Build the fused, lane-padded head params ONCE (hoisted out of the call path).

    Feature f = l*H + d of the concatenated CLS vector maps to (layer l, dim d),
    so W.reshape(NUM_LAYERS, H, n_out) gives exactly the per-layer weight slices.
    This assumes hidden_states are stacked in torch concat order [-1, -2, -3, -4].
    """
    w_all = jnp.concatenate(
        [w_cls.astype(jnp.float32), w_reg.astype(jnp.float32)], axis=-1)   # (4096, 25)
    w_fused = jnp.zeros((NUM_LAYERS, H, N_PAD), jnp.float32)
    w_fused = w_fused.at[:, :, : N_CLS + N_REG].set(
        w_all.reshape(NUM_LAYERS, H, N_CLS + N_REG))
    b_fused = jnp.zeros((1, N_PAD), jnp.float32)
    b_fused = b_fused.at[:, :N_CLS].set(jnp.reshape(b_cls, (1, N_CLS)).astype(jnp.float32))
    b_fused = b_fused.at[:, N_CLS:N_CLS + N_REG].set(
        jnp.reshape(b_reg, (1, N_REG)).astype(jnp.float32))
    return w_fused, b_fused


def _choose_tb(batch):
    """Batch tile: large for MXU occupancy, multiple of 8, >=2 grid steps when possible."""
    if batch < 8:
        return batch                      # block == full dim is always legal
    half = -(-((batch + 1) // 2) // 8) * 8   # round_up(batch/2, 8)
    return max(8, min(256, half))         # cap keeps VMEM ~12 MiB (fits all gens)


@functools.partial(jax.jit, static_argnames=("tb",))
def custom_model_heads(hidden_states, w_fused, b_fused, *, tb=None):
    """hidden_states: (4, B, S, H) float32, stacked [last, last-1, last-2, last-3].

    w_fused/b_fused: outputs of prepare_fused_head_params (built once, reused).
    Returns (outputs_classifier (B, 5), outputs_regressor (B, 5, 4)).
    """
    L, B, S, Hdim = hidden_states.shape
    assert L == NUM_LAYERS and Hdim == H
    tile = _choose_tb(B) if tb is None else tb

    # Free trailing-dims merge (bitcast under jit): the CLS token of every
    # (layer, batch) row is the first H lanes of the last axis, so the BlockSpec
    # below DMAs only those 4 KiB/row straight from the strided HBM source.
    h_flat = hidden_states.reshape(L, B, S * Hdim)

    grid = (pl.cdiv(B, tile),)   # partial last tile is clipped by Pallas; its
                                 # garbage rows are per-row only (no cross-row
                                 # reduction) and never written back.
    fused_out = pl.pallas_call(
        _heads_kernel,
        out_shape=jax.ShapeDtypeStruct((B, N_PAD), jnp.float32),
        grid_spec=pltpu.PrefetchScalarGridSpec(
            num_scalar_prefetch=0,
            grid=grid,
            in_specs=[
                # CLS activations only: tile the batch axis, first-H window of S*H.
                pl.BlockSpec((NUM_LAYERS, tile, H), lambda i: (0, i, 0)),
                # Fused weights / bias: grid-invariant (not re-DMAed per step).
                pl.BlockSpec((NUM_LAYERS, H, N_PAD), lambda i: (0, 0, 0)),
                pl.BlockSpec((1, N_PAD), lambda i: (0, 0)),
            ],
            out_specs=pl.BlockSpec((tile, N_PAD), lambda i: (i, 0)),
        ),
        compiler_params=pltpu.CompilerParams(
            dimension_semantics=("parallel",)),   # batch tiles shard across TCs (v7x)
    )(h_flat, w_fused, b_fused)

    # Split the fused, lane-dense output (pure glue, fused under jit).
    out_cls = fused_out[:, :N_CLS]                                # sigmoid applied in-kernel
    out_reg = fused_out[:, N_CLS:N_CLS + N_REG].reshape(-1, 5, 4)
    return out_cls, out_reg


def _reference(hidden_states, w_cls, b_cls, w_reg, b_reg):
    feats = jnp.concatenate(
        [hidden_states[l, :, 0, :] for l in range(NUM_LAYERS)], axis=-1)
    ref_cls = jax.nn.sigmoid(feats @ w_cls + b_cls)
    ref_reg = (feats @ w_reg + b_reg).reshape(-1, 5, 4)
    return ref_cls, ref_reg


if __name__ == "__main__":
    key = jax.random.PRNGKey(0)
    k_h, k_wc, k_bc, k_wr, k_br = jax.random.split(key, 5)

    # Deterministic parameter init (nn.Linear-style uniform bound = 1/sqrt(fan_in)).
    bound = 1.0 / jnp.sqrt(jnp.float32(FEAT))
    w_cls = jax.random.uniform(k_wc, (FEAT, N_CLS), jnp.float32, -bound, bound)
    b_cls = jax.random.uniform(k_bc, (N_CLS,), jnp.float32, -bound, bound)
    w_reg = jax.random.uniform(k_wr, (FEAT, N_REG), jnp.float32, -bound, bound)
    b_reg = jax.random.uniform(k_br, (N_REG,), jnp.float32, -bound, bound)

    # Fused head params built ONCE and reused across forward calls.
    w_fused, b_fused = prepare_fused_head_params(w_cls, b_cls, w_reg, b_reg)

    # --- small synthetic test (B=2, S=8): single full tile ----------------------
    B, S = 2, 8
    hidden_states = jax.random.normal(k_h, (NUM_LAYERS, B, S, H), dtype=jnp.float32)
    out_cls, out_reg = custom_model_heads(hidden_states, w_fused, b_fused)
    jax.block_until_ready((out_cls, out_reg))

    ref_cls, ref_reg = _reference(hidden_states, w_cls, b_cls, w_reg, b_reg)
    assert out_cls.shape == (B, 5) and out_reg.shape == (B, 5, 4)
    assert jnp.allclose(out_cls, ref_cls, atol=1e-4, rtol=1e-4)
    assert jnp.allclose(out_reg, ref_reg, atol=1e-4, rtol=1e-4)

    # --- second test (B=20): multi-step grid + partial last batch tile ----------
    B2, S2 = 20, 8
    hidden_states2 = jax.random.normal(
        jax.random.PRNGKey(1), (NUM_LAYERS, B2, S2, H), dtype=jnp.float32)
    out_cls2, out_reg2 = custom_model_heads(hidden_states2, w_fused, b_fused)
    jax.block_until_ready((out_cls2, out_reg2))

    ref_cls2, ref_reg2 = _reference(hidden_states2, w_cls, b_cls, w_reg, b_reg)
    assert out_cls2.shape == (B2, 5) and out_reg2.shape == (B2, 5, 4)
    assert jnp.allclose(out_cls2, ref_cls2, atol=1e-4, rtol=1e-4)
    assert jnp.allclose(out_reg2, ref_reg2, atol=1e-4, rtol=1e-4)

    print("KERNEL_OK")
</pallas_src>

<mosaic_0001>
module attributes {stable_mosaic.version = 11 : i64} {
  func.func @_heads_kernel(%arg0: i32, %arg1: memref<4x2x1024xf32, #tpu.memory_space<vmem>>, %arg2: memref<4x1024x128xf32, #tpu.memory_space<vmem>>, %arg3: memref<1x128xf32, #tpu.memory_space<vmem>>, %arg4: memref<2x128xf32, #tpu.memory_space<vmem>>) attributes {dimension_semantics = [#tpu.dimension_semantics<parallel>], iteration_bounds = array<i64: 1>, scalar_prefetch = 0 : i64, scratch_operands = 0 : i64, tpu.core_type = #tpu.core_type<tc>, window_params = [{transform_indices = @transform_0, window_bounds = array<i64: 4, 2, 1024>}, {pipeline_mode = #tpu.pipeline_mode<synchronous>, transform_indices = @transform_1, window_bounds = array<i64: 4, 1024, 128>}, {pipeline_mode = #tpu.pipeline_mode<synchronous>, transform_indices = @transform_2, window_bounds = array<i64: 1, 128>}, {transform_indices = @transform_3, window_bounds = array<i64: 2, 128>}]} {
    %c0 = arith.constant 0 : index
    %c0_0 = arith.constant 0 : index
    %c0_1 = arith.constant 0 : index
    %0 = vector.load %arg1[%c0, %c0_0, %c0_1] : memref<4x2x1024xf32, #tpu.memory_space<vmem>>, vector<1x2x1024xf32>
    %1 = vector.shape_cast %0 : vector<1x2x1024xf32> to vector<2x1024xf32>
    %c0_2 = arith.constant 0 : index
    %c0_3 = arith.constant 0 : index
    %c0_4 = arith.constant 0 : index
    %2 = vector.load %arg2[%c0_2, %c0_3, %c0_4] : memref<4x1024x128xf32, #tpu.memory_space<vmem>>, vector<1x1024x128xf32>
    %3 = vector.shape_cast %2 : vector<1x1024x128xf32> to vector<1024x128xf32>
    %cst = arith.constant dense<0.000000e+00> : vector<2x128xf32>
    %4 = tpu.matmul %1, %3, %cst {dimension_numbers = #tpu.dot_dimension_numbers<[1], [0], [0], [1], [0, 0, 1, 1], [], []>} : vector<2x1024xf32>, vector<1024x128xf32>, vector<2x128xf32> -> vector<2x128xf32>
    %c1 = arith.constant 1 : index
    %c0_5 = arith.constant 0 : index
    %c0_6 = arith.constant 0 : index
    %5 = vector.load %arg1[%c1, %c0_5, %c0_6] : memref<4x2x1024xf32, #tpu.memory_space<vmem>>, vector<1x2x1024xf32>
    %6 = vector.shape_cast %5 : vector<1x2x1024xf32> to vector<2x1024xf32>
    %c1_7 = arith.constant 1 : index
    %c0_8 = arith.constant 0 : index
    %c0_9 = arith.constant 0 : index
    %7 = vector.load %arg2[%c1_7, %c0_8, %c0_9] : memref<4x1024x128xf32, #tpu.memory_space<vmem>>, vector<1x1024x128xf32>
    %8 = vector.shape_cast %7 : vector<1x1024x128xf32> to vector<1024x128xf32>
    %cst_10 = arith.constant dense<0.000000e+00> : vector<2x128xf32>
    %9 = tpu.matmul %6, %8, %cst_10 {dimension_numbers = #tpu.dot_dimension_numbers<[1], [0], [0], [1], [0, 0, 1, 1], [], []>} : vector<2x1024xf32>, vector<1024x128xf32>, vector<2x128xf32> -> vector<2x128xf32>
    %10 = arith.addf %4, %9 : vector<2x128xf32>
    %c2 = arith.constant 2 : index
    %c0_11 = arith.constant 0 : index
    %c0_12 = arith.constant 0 : index
    %11 = vector.load %arg1[%c2, %c0_11, %c0_12] : memref<4x2x1024xf32, #tpu.memory_space<vmem>>, vector<1x2x1024xf32>
    %12 = vector.shape_cast %11 : vector<1x2x1024xf32> to vector<2x1024xf32>
    %c2_13 = arith.constant 2 : index
    %c0_14 = arith.constant 0 : index
    %c0_15 = arith.constant 0 : index
    %13 = vector.load %arg2[%c2_13, %c0_14, %c0_15] : memref<4x1024x128xf32, #tpu.memory_space<vmem>>, vector<1x1024x128xf32>
    %14 = vector.shape_cast %13 : vector<1x1024x128xf32> to vector<1024x128xf32>
    %cst_16 = arith.constant dense<0.000000e+00> : vector<2x128xf32>
    %15 = tpu.matmul %12, %14, %cst_16 {dimension_numbers = #tpu.dot_dimension_numbers<[1], [0], [0], [1], [0, 0, 1, 1], [], []>} : vector<2x1024xf32>, vector<1024x128xf32>, vector<2x128xf32> -> vector<2x128xf32>
    %16 = arith.addf %10, %15 : vector<2x128xf32>
    %c3 = arith.constant 3 : index
    %c0_17 = arith.constant 0 : index
    %c0_18 = arith.constant 0 : index
    %17 = vector.load %arg1[%c3, %c0_17, %c0_18] : memref<4x2x1024xf32, #tpu.memory_space<vmem>>, vector<1x2x1024xf32>
    %18 = vector.shape_cast %17 : vector<1x2x1024xf32> to vector<2x1024xf32>
    %c3_19 = arith.constant 3 : index
    %c0_20 = arith.constant 0 : index
    %c0_21 = arith.constant 0 : index
    %19 = vector.load %arg2[%c3_19, %c0_20, %c0_21] : memref<4x1024x128xf32, #tpu.memory_space<vmem>>, vector<1x1024x128xf32>
    %20 = vector.shape_cast %19 : vector<1x1024x128xf32> to vector<1024x128xf32>
    %cst_22 = arith.constant dense<0.000000e+00> : vector<2x128xf32>
    %21 = tpu.matmul %18, %20, %cst_22 {dimension_numbers = #tpu.dot_dimension_numbers<[1], [0], [0], [1], [0, 0, 1, 1], [], []>} : vector<2x1024xf32>, vector<1024x128xf32>, vector<2x128xf32> -> vector<2x128xf32>
    %22 = arith.addf %16, %21 : vector<2x128xf32>
    %c0_23 = arith.constant 0 : index
    %c0_24 = arith.constant 0 : index
    %23 = vector.load %arg3[%c0_23, %c0_24] : memref<1x128xf32, #tpu.memory_space<vmem>>, vector<1x128xf32>
    %24 = vector.broadcast %23 : vector<1x128xf32> to vector<2x128xf32>
    %25 = arith.addf %22, %24 : vector<2x128xf32>
    %26 = tpu.iota {dimensions = array<i32: 1>} : vector<2x128xi32>
    %c5_i32 = arith.constant 5 : i32
    %27 = vector.broadcast %c5_i32 : i32 to vector<2x128xi32>
    %28 = arith.cmpi slt, %26, %27 : vector<2x128xi32>
    %29 = arith.negf %25 : vector<2x128xf32>
    %30 = math.exp %29 : vector<2x128xf32>
    %cst_25 = arith.constant 1.000000e+00 : f32
    %31 = vector.broadcast %cst_25 : f32 to vector<2x128xf32>
    %32 = arith.addf %31, %30 : vector<2x128xf32>
    %33 = arith.divf %31, %32 : vector<2x128xf32>
    %34 = arith.select %28, %33, %25 : vector<2x128xi1>, vector<2x128xf32>
    %c0_26 = arith.constant 0 : index
    %c0_27 = arith.constant 0 : index
    %35 = vector.load %arg4[%c0_26, %c0_27] : memref<2x128xf32, #tpu.memory_space<vmem>>, vector<2x128xf32>
    tpu.vector_store %arg4[%c0_26, %c0_27], %34 {strides = array<i32>} : memref<2x128xf32, #tpu.memory_space<vmem>>, vector<2x128xf32>,
    return
  }
  func.func @transform_0(%arg0: i32) -> (i32, i32, i32) {
    %c0_i32 = arith.constant 0 : i32
    %c0_i32_0 = arith.constant 0 : i32
    %c0_i32_1 = arith.constant 0 : i32
    return %c0_i32, %arg0, %c0_i32_0 : i32, i32, i32
  }
  func.func @transform_1(%arg0: i32) -> (i32, i32, i32) {
    %c0_i32 = arith.constant 0 : i32
    %c0_i32_0 = arith.constant 0 : i32
    %c0_i32_1 = arith.constant 0 : i32
    %c0_i32_2 = arith.constant 0 : i32
    return %c0_i32, %c0_i32_0, %c0_i32_1 : i32, i32, i32
  }
  func.func @transform_2(%arg0: i32) -> (i32, i32) {
    %c0_i32 = arith.constant 0 : i32
    %c0_i32_0 = arith.constant 0 : i32
    %c0_i32_1 = arith.constant 0 : i32
    return %c0_i32, %c0_i32_0 : i32, i32
  }
  func.func @transform_3(%arg0: i32) -> (i32, i32) {
    %c0_i32 = arith.constant 0 : i32
    %c0_i32_0 = arith.constant 0 : i32
    return %arg0, %c0_i32 : i32, i32
  }
}

</mosaic_0001>

<bundles_post_ra>
// kernel: custom_model_heads.1
= control target key start
LH: loop header
LB: loop body
LE: loop exit
PB: predicated region body
PF: predicated region fallthrough
CT: control target
= control target key end

     0   :  { %8 = vsyncpa [#allocation4], 0  ;;  %s3057_s24 = smov [#allocation3]   ;;  %s3268_s0 = inlined_call_operand.vmem [shape: f32[4,2,8192], index: 0, kind: input, shape index: {}]   ;;  %s3269_s1 = inlined_call_operand.hbm [shape: f32[4,1024,128], index: 1, kind: input, shape index: {}]   ;;  %s3270_s2 = inlined_call_operand.hbm [shape: f32[1,128], index: 2, kind: input, shape index: {}]   ;;  %s3271_s3 = inlined_call_operand.vmem [shape: f32[2,128], index: 3, kind: output, shape index: {}]  }
   0x1   :  { %v3085_v0 = vld [vmem:[%s3268_s0] sm:$0xff]  ;;  %v3090_v1 = vld [vmem:[%s3268_s0 + $0x8] sm:$0xff]  ;;  %s48_s25 = sshll.u32 %s3057_s24, 4  ;;  %s49_s25 = int_to_ptr.vmem [resolvable:$true] %s48_s25 }
   0x2   :  { %v28_v2 = vld [vmem:[%s3268_s0 + $0x80] sm:$0xff]  ;;  %v3098_v3 = vld [vmem:[%s3268_s0 + $0x88] sm:$0xff] }
   0x3   :  { %v3103_v4 = vld [vmem:[%s3268_s0 + $0x100] sm:$0xff]  ;;  %v3108_v5 = vld [vmem:[%s3268_s0 + $0x108] sm:$0xff] }
   0x4   :  { %v3113_v6 = vld [vmem:[%s3268_s0 + $0x180] sm:$0xff]  ;;  %v3118_v7 = vld [vmem:[%s3268_s0 + $0x188] sm:$0xff] }
   0x5   :  { %9 = vsyncpa [#allocation6], 0  ;;  %s3009_s5 = scalar_lea.hbm %s3269_s1, 65536 }
   0x6   :  { %p3010_p0 = scmp.ne.s32.totalorder %s3269_s1, %s3009_s5  ;;  %p3013_p1 = scmp.lt.u32.totalorder %s3009_s5, %s3269_s1 }
   0x8   :  { %p3015_p2 = pnand %p3013_p1, %p3010_p0 }
   0xa   :  { %3018 = shalt.err (!%p3015_p2)
}
   0xb   :  { %s3019_s10 = scalar_lea.vmem %s49_s25, 65536  ;;  %p3024_p4 = scmp.lt.s32.totalorder %s49_s25, %s49_s25 }
   0xc   :  { %p3020_p3 = scmp.ne.s32.totalorder %s49_s25, %s3019_s10  ;;  %p3025_p5 = scmp.lt.s32.totalorder %s3019_s10, %s3019_s10 }
   0xe   :  { %p3026_p6 = por %p3025_p5, %p3024_p4 }
  0x10   :  { %p3027_p7 = pnand %p3026_p6, %p3020_p3 }
  0x12   :  { %3030 = shalt.err (!%p3027_p7)
}
  0x13   :  { %s3058_s0 = smov 128   ;;  %s3059_s11 = smov 8  }
  0x14   :  { %54 = dma.hbm_to_vmem [thread:$0]  %s3269_s1, 65536, %s49_s25, [#allocation4], %s3058_s0, %s3058_s0, %s3059_s11  }
  0x15   :  { %s3060_s14 = smov [#allocation5]   ;;  %s3031_s18 = scalar_lea.hbm %s3270_s2, 16 }
  0x16   :  { %s61_s15 = sshll.u32 %s3060_s14, 4  ;;  %p3032_p8 = scmp.ne.s32.totalorder %s3270_s2, %s3031_s18  ;;  %s62_s15 = int_to_ptr.vmem [resolvable:$true] %s61_s15 }
  0x17   :  { %p3035_p9 = scmp.lt.u32.totalorder %s3031_s18, %s3270_s2 }
  0x19   :  { %p3037_p10 = pnand %p3035_p9, %p3032_p8 }
  0x1b   :  { %3040 = shalt.err (!%p3037_p10)
}
  0x1c   :  { %s3041_s23 = scalar_lea.vmem %s62_s15, 16  ;;  %s3045_s1 = scalar_lea.vmem %s62_s15, 32 }
  0x1d   :  { %p3042_p11 = scmp.ne.s32.totalorder %s62_s15, %s3041_s23  ;;  %p3046_p12 = scmp.lt.s32.totalorder %s62_s15, %s62_s15 }
  0x1e   :  { %p3047_p13 = scmp.lt.s32.totalorder %s3045_s1, %s3041_s23 }
  0x20   :  { %p3048_p0 = por %p3047_p13, %p3046_p12 }
  0x22   :  { %p3049_p1 = pnand %p3048_p0, %p3042_p11 }
  0x24   :  { %3052 = shalt.err (!%p3049_p1)
}
  0x25   :  { %64 = dma.hbm_to_vmem [thread:$0]  %s3270_s2, 16, %s62_s15, [#allocation6]  }
  0x26   :  { %3053 = dma.done.wait [#allocation4], 65536  }
  0x27   :  { %3054 = vsyncadd [#allocation4], 4294901760 }
  0x28   :  { %3055 = dma.done.wait [#allocation6], 16  }
  0x29   :  { %3056 = vsyncadd [#allocation6], 4294967280  ;;  %v341_v8 = vlaneseq  ;;  %v3061_v9 = vmov 1983009808   ;;  %v337_v13 = vcombine.high %v28_v2, %v28_v2  ;;  %v223_v15 = vld [vmem:[#allocation3 + $0x480] sm:$0xff]  ;;  %v224_v16 = vld [vmem:[#allocation3 + $0x488] sm:$0xff] }
  0x2a   :  { %v339_v10 = vunpack.c.l.s4 %v3061_v9  ;;  %v255_v17 = vld [vmem:[#allocation3 + $0x580] sm:$0xff]  ;;  %v2488_v20 = vpack.c.bf16 %v224_v16, %v223_v15  ;;  %v256_v21 = vld [vmem:[#allocation3 + $0x588] sm:$0xff]  ;;  %v225_v28 = vld [vmem:[#allocation3 + $0x490] sm:$0xff] }
  0x2b   :  { %v342_v11 = vshrl.u32 %v341_v8, 7  ;;  %v207_v22 = vld [vmem:[#allocation3 + $0x400] sm:$0xff]  ;;  %v208_v23 = vld [vmem:[#allocation3 + $0x408] sm:$0xff]  ;;  %v2520_v24 = vpack.c.bf16 %v256_v21, %v255_v17  ;;  %v226_v31 = vld [vmem:[#allocation3 + $0x498] sm:$0xff] }
  0x2c   :  { %v340_v12 = vunpack.c.0.s8 %v339_v10  ;;  %v2490_v25 = vpack.c.bf16 %v208_v23, %v207_v22  ;;  %v239_v26 = vld [vmem:[#allocation3 + $0x500] sm:$0xff]  ;;  %v240_v27 = vld [vmem:[#allocation3 + $0x508] sm:$0xff]  ;;  %2489 = vmatprep.subr.bf16.mxu0 %v2488_v20  ;;  %v257_v32 = vld [vmem:[#allocation3 + $0x590] sm:$0xff]  ;;  %v2492_v35 = vpack.c.bf16 %v226_v31, %v225_v28 }
  0x2d   :  { %v2522_v30 = vpack.c.bf16 %v240_v27, %v239_v26  ;;  %v258_v33 = vld [vmem:[#allocation3 + $0x598] sm:$0xff]  ;;  %2521 = vmatprep.subr.bf16.mxu1 %v2520_v24  ;;  %v209_v37 = vld [vmem:[#allocation3 + $0x410] sm:$0xff]  ;;  %v227_v42 = vld [vmem:[#allocation3 + $0x4a0] sm:$0xff] }
  0x2e   :  { %v3145_v14 = vsub.s32 %v340_v12, %v342_v11  ;;  %2491 = vmatpush3.bf16.msra.mxu0 %v2490_v25  ;;  %v2524_v36 = vpack.c.bf16 %v258_v33, %v257_v32  ;;  %v210_v38 = vld [vmem:[#allocation3 + $0x418] sm:$0xff]  ;;  %v241_v39 = vld [vmem:[#allocation3 + $0x510] sm:$0xff]  ;;  %v228_v43 = vld [vmem:[#allocation3 + $0x4a8] sm:$0xff] }
  0x2f   :  { %2523 = vmatpush3.bf16.msra.mxu1 %v2522_v30  ;;  %v2494_v40 = vpack.c.bf16 %v210_v38, %v209_v37  ;;  %v242_v41 = vld [vmem:[#allocation3 + $0x518] sm:$0xff]  ;;  %2493 = vmatprep.subr.bf16.mxu0 %v2492_v35  ;;  %v2496_v45 = vpack.c.bf16 %v228_v43, %v227_v42  ;;  %v259_v46 = vld [vmem:[#allocation3 + $0x5a0] sm:$0xff]  ;;  %v260_v47 = vld [vmem:[#allocation3 + $0x5a8] sm:$0xff] }
  0x30   :  { %v3148_v18 = vrot.slane %v28_v2, %v3145_v14  ;;  %v3151_v19 = vrot.slane %v337_v13, %v3145_v14  ;;  %2525 = vmatprep.subr.bf16.mxu1 %v2524_v36  ;;  %v2526_v44 = vpack.c.bf16 %v242_v41, %v241_v39  ;;  %v211_v48 = vld [vmem:[#allocation3 + $0x420] sm:$0xff]  ;;  %v2528_v49 = vpack.c.bf16 %v260_v47, %v259_v46  ;;  %v212_v50 = vld [vmem:[#allocation3 + $0x428] sm:$0xff]  ;;  %v229_v54 = vld [vmem:[#allocation3 + $0x4b0] sm:$0xff] }
  0x31   :  { %v243_v51 = vld [vmem:[#allocation3 + $0x520] sm:$0xff]  ;;  %v244_v52 = vld [vmem:[#allocation3 + $0x528] sm:$0xff]  ;;  %v2498_v53 = vpack.c.bf16 %v212_v50, %v211_v48  ;;  %v230_v55 = vld [vmem:[#allocation3 + $0x4b8] sm:$0xff] }
  0x32   :  { %v352_v29 = vcombine.high %v3148_v18, %v3148_v18  ;;  %v353_v34 = vcombine.high %v3151_v19, %v3151_v19  ;;  %2495 = vmatpush3.bf16.msra.mxu0 %v2494_v40  ;;  %v261_v56 = vld [vmem:[#allocation3 + $0x5b0] sm:$0xff]  ;;  %v2530_v57 = vpack.c.bf16 %v244_v52, %v243_v51  ;;  %v2500_v58 = vpack.c.bf16 %v230_v55, %v229_v54  ;;  %v262_v59 = vld [vmem:[#allocation3 + $0x5b8] sm:$0xff]  ;;  %v231_v9 = vld [vmem:[#allocation3 + $0x4c0] sm:$0xff] }
  0x33   :  { %2527 = vmatpush3.bf16.msra.mxu1 %v2526_v44  ;;  %2497 = vmatprep.subr.bf16.mxu0 %v2496_v45  ;;  %v213_v60 = vld [vmem:[#allocation3 + $0x430] sm:$0xff]  ;;  %v214_v61 = vld [vmem:[#allocation3 + $0x438] sm:$0xff]  ;;  %v2532_v62 = vpack.c.bf16 %v262_v59, %v261_v56  ;;  %v232_v10 = vld [vmem:[#allocation3 + $0x4c8] sm:$0xff] }
  0x34   :  { %443 = vmatprep.mubr.f32.mxu0 %v352_v29  ;;  %513 = vmatprep.mubr.f32.mxu1 %v353_v34  ;;  %v245_v63 = vld [vmem:[#allocation3 + $0x530] sm:$0xff]  ;;  %v246_v2 = vld [vmem:[#allocation3 + $0x538] sm:$0xff]  ;;  %v263_v11 = vld [vmem:[#allocation3 + $0x5c0] sm:$0xff]  ;;  %v2502_v13 = vpack.c.bf16 %v214_v61, %v213_v60  ;;  %v2504_v16 = vpack.c.bf16 %v232_v10, %v231_v9 }
  0x35   :  { %2529 = vmatprep.subr.bf16.mxu1 %v2528_v49  ;;  %v264_v12 = vld [vmem:[#allocation3 + $0x5c8] sm:$0xff]  ;;  %v2534_v15 = vpack.c.bf16 %v246_v2, %v245_v63  ;;  %v215_v17 = vld [vmem:[#allocation3 + $0x440] sm:$0xff]  ;;  %v233_v24 = vld [vmem:[#allocation3 + $0x4d0] sm:$0xff]  ;;  %v354_v2 = vcombine.high %v3098_v3, %v3098_v3 }
  0x36   :  { %2499 = vmatpush3.bf16.msra.mxu0 %v2498_v53  ;;  %v216_v20 = vld [vmem:[#allocation3 + $0x448] sm:$0xff]  ;;  %v247_v21 = vld [vmem:[#allocation3 + $0x540] sm:$0xff]  ;;  %v2536_v22 = vpack.c.bf16 %v264_v12, %v263_v11  ;;  %v234_v25 = vld [vmem:[#allocation3 + $0x4d8] sm:$0xff] }
  0x37   :  { %2531 = vmatpush3.bf16.msra.mxu1 %v2530_v57  ;;  %2501 = vmatprep.subr.bf16.mxu0 %v2500_v58  ;;  %v248_v23 = vld [vmem:[#allocation3 + $0x548] sm:$0xff]  ;;  %v265_v26 = vld [vmem:[#allocation3 + $0x5d0] sm:$0xff]  ;;  %v266_v27 = vld [vmem:[#allocation3 + $0x5d8] sm:$0xff]  ;;  %v2506_v28 = vpack.c.bf16 %v216_v20, %v215_v17  ;;  %v2508_v30 = vpack.c.bf16 %v234_v25, %v233_v24  ;;  %v3164_v25 = vrot.slane %v354_v2, %v3145_v14 }
  0x38   :  { %2533 = vmatprep.subr.bf16.mxu1 %v2532_v62  ;;  %v2538_v29 = vpack.c.bf16 %v248_v23, %v247_v21  ;;  %v217_v31 = vld [vmem:[#allocation3 + $0x450] sm:$0xff]  ;;  %v218_v32 = vld [vmem:[#allocation3 + $0x458] sm:$0xff]  ;;  %v2540_v34 = vpack.c.bf16 %v266_v27, %v265_v26  ;;  %v235_v36 = vld [vmem:[#allocation3 + $0x4e0] sm:$0xff] }
  0x39   :  { %v249_v33 = vld [vmem:[#allocation3 + $0x550] sm:$0xff]  ;;  %v250_v35 = vld [vmem:[#allocation3 + $0x558] sm:$0xff]  ;;  %v236_v37 = vld [vmem:[#allocation3 + $0x4e8] sm:$0xff]  ;;  %v2510_v40 = vpack.c.bf16 %v218_v32, %v217_v31 }
  0x3a   :  { %2503 = vmatpush3.bf16.msra.mxu0 %v2502_v13  ;;  %v267_v38 = vld [vmem:[#allocation3 + $0x5e0] sm:$0xff]  ;;  %v268_v39 = vld [vmem:[#allocation3 + $0x5e8] sm:$0xff]  ;;  %v2542_v41 = vpack.c.bf16 %v250_v35, %v249_v33  ;;  %v2512_v42 = vpack.c.bf16 %v236_v37, %v235_v36  ;;  %v237_v48 = vld [vmem:[#allocation3 + $0x4f0] sm:$0xff] }
  0x3b   :  { %2535 = vmatpush3.bf16.msra.mxu1 %v2534_v15  ;;  %2505 = vmatprep.subr.bf16.mxu0 %v2504_v16  ;;  %v219_v43 = vld [vmem:[#allocation3 + $0x460] sm:$0xff]  ;;  %v220_v44 = vld [vmem:[#allocation3 + $0x468] sm:$0xff]  ;;  %v2544_v46 = vpack.c.bf16 %v268_v39, %v267_v38  ;;  %v238_v49 = vld [vmem:[#allocation3 + $0x4f8] sm:$0xff]  ;;  %v370_v38 = vcombine.high %v3164_v25, %v3164_v25 }
  0x3c   :  { %2537 = vmatprep.subr.bf16.mxu1 %v2536_v22  ;;  %v251_v45 = vld [vmem:[#allocation3 + $0x560] sm:$0xff]  ;;  %v252_v47 = vld [vmem:[#allocation3 + $0x568] sm:$0xff]  ;;  %v269_v50 = vld [vmem:[#allocation3 + $0x5f0] sm:$0xff]  ;;  %v2514_v52 = vpack.c.bf16 %v220_v44, %v219_v43  ;;  %v2516_v54 = vpack.c.bf16 %v238_v49, %v237_v48  ;;  %v3161_v22 = vrot.slane %v3098_v3, %v3145_v14 }
  0x3d   :  { %v270_v51 = vld [vmem:[#allocation3 + $0x5f8] sm:$0xff]  ;;  %v2546_v53 = vpack.c.bf16 %v252_v47, %v251_v45  ;;  %v221_v55 = vld [vmem:[#allocation3 + $0x470] sm:$0xff]  ;;  %v287_v60 = vld [vmem:[#allocation3 + $0x680] sm:$0xff] }
  0x3e   :  { %2507 = vmatpush3.bf16.msra.mxu0 %v2506_v28  ;;  %v222_v56 = vld [vmem:[#allocation3 + $0x478] sm:$0xff]  ;;  %v253_v57 = vld [vmem:[#allocation3 + $0x570] sm:$0xff]  ;;  %v2548_v58 = vpack.c.bf16 %v270_v51, %v269_v50  ;;  %v288_v61 = vld [vmem:[#allocation3 + $0x688] sm:$0xff]  ;;  %v369_v35 = vcombine.high %v3161_v22, %v3161_v22 }
  0x3f   :  { %2539 = vmatpush3.bf16.msra.mxu1 %v2538_v29  ;;  %2509 = vmatprep.subr.bf16.mxu0 %v2508_v30  ;;  %v254_v59 = vld [vmem:[#allocation3 + $0x578] sm:$0xff]  ;;  %v319_v62 = vld [vmem:[#allocation3 + $0x780] sm:$0xff]  ;;  %v320_v63 = vld [vmem:[#allocation3 + $0x788] sm:$0xff]  ;;  %v2518_v9 = vpack.c.bf16 %v222_v56, %v221_v55  ;;  %v2552_v11 = vpack.c.bf16 %v288_v61, %v287_v60 }
  0x40   :  { %2541 = vmatprep.subr.bf16.mxu1 %v2540_v34  ;;  %v2550_v10 = vpack.c.bf16 %v254_v59, %v253_v57  ;;  %v271_v12 = vld [vmem:[#allocation3 + $0x600] sm:$0xff]  ;;  %v272_v13 = vld [vmem:[#allocation3 + $0x608] sm:$0xff]  ;;  %v2584_v16 = vpack.c.bf16 %v320_v63, %v319_v62  ;;  %v289_v20 = vld [vmem:[#allocation3 + $0x690] sm:$0xff] }
  0x41   :  { %v303_v15 = vld [vmem:[#allocation3 + $0x700] sm:$0xff]  ;;  %v304_v17 = vld [vmem:[#allocation3 + $0x708] sm:$0xff]  ;;  %v290_v21 = vld [vmem:[#allocation3 + $0x698] sm:$0xff]  ;;  %v2554_v26 = vpack.c.bf16 %v272_v13, %v271_v12 }
  0x42   :  { %2511 = vmatpush3.bf16.msra.mxu0 %v2510_v40  ;;  %v321_v23 = vld [vmem:[#allocation3 + $0x790] sm:$0xff]  ;;  %v322_v24 = vld [vmem:[#allocation3 + $0x798] sm:$0xff]  ;;  %v2586_v27 = vpack.c.bf16 %v304_v17, %v303_v15  ;;  %v2556_v28 = vpack.c.bf16 %v290_v21, %v289_v20  ;;  %v291_v34 = vld [vmem:[#allocation3 + $0x6a0] sm:$0xff] }
  0x43   :  { %2543 = vmatpush3.bf16.msra.mxu1 %v2542_v41  ;;  %2513 = vmatprep.subr.bf16.mxu0 %v2512_v42  ;;  %v273_v29 = vld [vmem:[#allocation3 + $0x610] sm:$0xff]  ;;  %v274_v30 = vld [vmem:[#allocation3 + $0x618] sm:$0xff]  ;;  %v2588_v32 = vpack.c.bf16 %v322_v24, %v321_v23  ;;  %v292_v3 = vld [vmem:[#allocation3 + $0x6a8] sm:$0xff] }
  0x44   :  { %2545 = vmatprep.subr.bf16.mxu1 %v2544_v46  ;;  %v305_v31 = vld [vmem:[#allocation3 + $0x710] sm:$0xff]  ;;  %v306_v33 = vld [vmem:[#allocation3 + $0x718] sm:$0xff]  ;;  %v323_v36 = vld [vmem:[#allocation3 + $0x7a0] sm:$0xff]  ;;  %v2558_v39 = vpack.c.bf16 %v274_v30, %v273_v29  ;;  %v2560_v41 = vpack.c.bf16 %v292_v3, %v291_v34 }
  0x45   :  { %v324_v37 = vld [vmem:[#allocation3 + $0x7a8] sm:$0xff]  ;;  %v2590_v40 = vpack.c.bf16 %v306_v33, %v305_v31  ;;  %v275_v42 = vld [vmem:[#allocation3 + $0x620] sm:$0xff]  ;;  %v294_v47 = vld [vmem:[#allocation3 + $0x6b8] sm:$0xff] }
  0x46   :  { %2515 = vmatpush3.bf16.msra.mxu0 %v2514_v52  ;;  %v276_v43 = vld [vmem:[#allocation3 + $0x628] sm:$0xff]  ;;  %v307_v44 = vld [vmem:[#allocation3 + $0x720] sm:$0xff]  ;;  %v2592_v45 = vpack.c.bf16 %v324_v37, %v323_v36  ;;  %v325_v48 = vld [vmem:[#allocation3 + $0x7b0] sm:$0xff] }
  0x47   :  { %2547 = vmatpush3.bf16.msra.mxu1 %v2546_v53  ;;  %2517 = vmatprep.subr.bf16.mxu0 %v2516_v54  ;;  %v308_v46 = vld [vmem:[#allocation3 + $0x728] sm:$0xff]  ;;  %v326_v49 = vld [vmem:[#allocation3 + $0x7b8] sm:$0xff]  ;;  %v277_v52 = vld [vmem:[#allocation3 + $0x630] sm:$0xff] }
  0x48   :  { %2549 = vmatprep.subr.bf16.mxu1 %v2548_v58  ;;  %v2594_v50 = vpack.c.bf16 %v308_v46, %v307_v44  ;;  %v278_v53 = vld [vmem:[#allocation3 + $0x638] sm:$0xff]  ;;  %v309_v54 = vld [vmem:[#allocation3 + $0x730] sm:$0xff]  ;;  %v2596_v55 = vpack.c.bf16 %v326_v49, %v325_v48  ;;  %v295_v57 = vld [vmem:[#allocation3 + $0x6c0] sm:$0xff] }
  0x49   :  { %v310_v56 = vld [vmem:[#allocation3 + $0x738] sm:$0xff]  ;;  %v296_v58 = vld [vmem:[#allocation3 + $0x6c8] sm:$0xff]  ;;  %v327_v59 = vld [vmem:[#allocation3 + $0x7c0] sm:$0xff]  ;;  %v2566_v61 = vpack.c.bf16 %v278_v53, %v277_v52 }
  0x4a   :  { %2519 = vmatpush3.bf16.msra.mxu0 %v2518_v9  ;;  %v328_v60 = vld [vmem:[#allocation3 + $0x7c8] sm:$0xff]  ;;  %v2598_v62 = vpack.c.bf16 %v310_v56, %v309_v54  ;;  %v2568_v63 = vpack.c.bf16 %v296_v58, %v295_v57  ;;  %v279_v2 = vld [vmem:[#allocation3 + $0x640] sm:$0xff]  ;;  %v297_v13 = vld [vmem:[#allocation3 + $0x6d0] sm:$0xff] }
  0x4b   :  { %2551 = vmatpush3.bf16.msra.mxu1 %v2550_v10  ;;  %2553 = vmatprep.subr.bf16.mxu0 %v2552_v11  ;;  %v280_v9 = vld [vmem:[#allocation3 + $0x648] sm:$0xff]  ;;  %v311_v10 = vld [vmem:[#allocation3 + $0x740] sm:$0xff]  ;;  %v2600_v11 = vpack.c.bf16 %v328_v60, %v327_v59  ;;  %v298_v15 = vld [vmem:[#allocation3 + $0x6d8] sm:$0xff] }
  0x4c   :  { %2585 = vmatprep.subr.bf16.mxu1 %v2584_v16  ;;  %v312_v12 = vld [vmem:[#allocation3 + $0x748] sm:$0xff]  ;;  %v329_v16 = vld [vmem:[#allocation3 + $0x7d0] sm:$0xff]  ;;  %v330_v17 = vld [vmem:[#allocation3 + $0x7d8] sm:$0xff]  ;;  %v2570_v20 = vpack.c.bf16 %v280_v9, %v279_v2  ;;  %v2572_v23 = vpack.c.bf16 %v298_v15, %v297_v13 }
  0x4d   :  { %444 = vmatmul.mubr.f32.vlgmr.msra.gmra.mrb[0].mxu0 %v3148_v18  ;;  %v293_v18 = vld [vmem:[#allocation3 + $0x6b0] sm:$0xff]  ;;  %v2602_v21 = vpack.c.bf16 %v312_v12, %v311_v10  ;;  %v314_v29 = vld [vmem:[#allocation3 + $0x758] sm:$0xff]  ;;  %v299_v30 = vld [vmem:[#allocation3 + $0x6e0] sm:$0xff]  ;;  %v3176_v10 = vrot.slane %v3085_v0, %v3145_v14 }
  0x4e   :  { %514 = vmatmul.mubr.f32.vlgmr.msra.gmra.mrb[0].mxu1 %v3151_v19  ;;  %2555 = vmatpush3.bf16.msra.mxu0 %v2554_v26  ;;  %v2562_v19 = vpack.c.bf16 %v276_v43, %v275_v42  ;;  %v2564_v51 = vpack.c.bf16 %v294_v47, %v293_v18  ;;  %v281_v24 = vld [vmem:[#allocation3 + $0x650] sm:$0xff]  ;;  %v282_v26 = vld [vmem:[#allocation3 + $0x658] sm:$0xff]  ;;  %v300_v31 = vld [vmem:[#allocation3 + $0x6e8] sm:$0xff] }
  0x4f   :  { %2587 = vmatpush3.bf16.msra.mxu1 %v2586_v27  ;;  %2557 = vmatprep.subr.bf16.mxu0 %v2556_v28  ;;  %v313_v27 = vld [vmem:[#allocation3 + $0x750] sm:$0xff]  ;;  %v2604_v28 = vpack.c.bf16 %v330_v17, %v329_v16  ;;  %v332_v33 = vld [vmem:[#allocation3 + $0x7e8] sm:$0xff]  ;;  %v2574_v34 = vpack.c.bf16 %v282_v26, %v281_v24  ;;  %v283_v36 = vld [vmem:[#allocation3 + $0x660] sm:$0xff] }
  0x50   :  { %2589 = vmatprep.subr.bf16.mxu1 %v2588_v32  ;;  %583 = vmatprep.mubr.f32.mxu0 %v369_v35  ;;  %v331_v32 = vld [vmem:[#allocation3 + $0x7e0] sm:$0xff]  ;;  %v2606_v3 = vpack.c.bf16 %v314_v29, %v313_v27  ;;  %v2576_v35 = vpack.c.bf16 %v300_v31, %v299_v30  ;;  %v284_v37 = vld [vmem:[#allocation3 + $0x668] sm:$0xff]  ;;  %v302_v42 = vld [vmem:[#allocation3 + $0x6f8] sm:$0xff] }
  0x51   :  { %653 = vmatprep.mubr.f32.mxu1 %v370_v38  ;;  %v315_v38 = vld [vmem:[#allocation3 + $0x760] sm:$0xff]  ;;  %v333_v43 = vld [vmem:[#allocation3 + $0x7f0] sm:$0xff]  ;;  %v334_v44 = vld [vmem:[#allocation3 + $0x7f8] sm:$0xff] }
  0x52   :  { %2559 = vmatpush3.bf16.msra.mxu0 %v2558_v39  ;;  %v2608_v39 = vpack.c.bf16 %v332_v33, %v331_v32  ;;  %v285_v47 = vld [vmem:[#allocation3 + $0x670] sm:$0xff]  ;;  %v286_v48 = vld [vmem:[#allocation3 + $0x678] sm:$0xff]  ;;  %v92_v52 = vld [vmem:[#allocation3 + $0x88] sm:$0xff] }
  0x53   :  { %2591 = vmatpush3.bf16.msra.mxu1 %v2590_v40  ;;  %2561 = vmatprep.subr.bf16.mxu0 %v2560_v41  ;;  %v316_v40 = vld [vmem:[#allocation3 + $0x768] sm:$0xff]  ;;  %v301_v41 = vld [vmem:[#allocation3 + $0x6f0] sm:$0xff]  ;;  %v123_v53 = vld [vmem:[#allocation3 + $0x180] sm:$0xff]  ;;  %v2582_v56 = vpack.c.bf16 %v286_v48, %v285_v47 }
  0x54   :  { %2593 = vmatprep.subr.bf16.mxu1 %v2592_v45  ;;  %v2578_v45 = vpack.c.bf16 %v284_v37, %v283_v36  ;;  %v2610_v46 = vpack.c.bf16 %v316_v40, %v315_v38  ;;  %v2580_v18 = vpack.c.bf16 %v302_v42, %v301_v41  ;;  %v317_v49 = vld [vmem:[#allocation3 + $0x770] sm:$0xff]  ;;  %v124_v54 = vld [vmem:[#allocation3 + $0x188] sm:$0xff]  ;;  %v75_v59 = vld [vmem:[#allocation3] sm:$0xff] }
  0x55   :  { %v76_v60 = vld [vmem:[#allocation3 + $0x8] sm:$0xff]  ;;  %v93_v2 = vld [vmem:[#allocation3 + $0x90] sm:$0xff]  ;;  %v94_v9 = vld [vmem:[#allocation3 + $0x98] sm:$0xff] }
  0x56   :  { %2563 = vmatpush3.bf16.msra.mxu0 %v2562_v19  ;;  %v2612_v19 = vpack.c.bf16 %v334_v44, %v333_v43  ;;  %v126_v12 = vld [vmem:[#allocation3 + $0x198] sm:$0xff]  ;;  %v2618_v15 = vpack.c.bf16 %v76_v60, %v75_v59  ;;  %v2620_v17 = vpack.c.bf16 %v94_v9, %v93_v2  ;;  %v95_v27 = vld [vmem:[#allocation3 + $0xa0] sm:$0xff]  ;;  %v128_v30 = vld [vmem:[#allocation3 + $0x1a8] sm:$0xff] }
  0x57   :  { %2595 = vmatpush3.bf16.msra.mxu1 %v2594_v50  ;;  %2565 = vmatprep.subr.bf16.mxu0 %v2564_v51  ;;  %v318_v50 = vld [vmem:[#allocation3 + $0x778] sm:$0xff]  ;;  %v91_v51 = vld [vmem:[#allocation3 + $0x80] sm:$0xff]  ;;  %v112_v38 = vld [vmem:[#allocation3 + $0x128] sm:$0xff] }
  0x58   :  { %2597 = vmatprep.subr.bf16.mxu1 %v2596_v55  ;;  %v661_v55 = vcombine.high %v3085_v0, %v3085_v0  ;;  %v2614_v57 = vpack.c.bf16 %v318_v50, %v317_v49  ;;  %v2616_v58 = vpack.c.bf16 %v92_v52, %v91_v51  ;;  %v110_v26 = vld [vmem:[#allocation3 + $0x118] sm:$0xff]  ;;  %v96_v0 = vld [vmem:[#allocation3 + $0xa8] sm:$0xff]  ;;  %v127_v29 = vld [vmem:[#allocation3 + $0x1a0] sm:$0xff] }
  0x59   :  { %v111_v36 = vld [vmem:[#allocation3 + $0x120] sm:$0xff]  ;;  %v2656_v37 = vpack.c.bf16 %v128_v30, %v127_v29  ;;  %v129_v40 = vld [vmem:[#allocation3 + $0x1b0] sm:$0xff]  ;;  %v130_v41 = vld [vmem:[#allocation3 + $0x1b8] sm:$0xff] }
  0x5a   :  { %2567 = vmatpush3.bf16.msra.mxu0 %v2566_v61  ;;  %v107_v61 = vld [vmem:[#allocation3 + $0x100] sm:$0xff]  ;;  %v3179_v13 = vrot.slane %v661_v55, %v3145_v14  ;;  %v2658_v42 = vpack.c.bf16 %v112_v38, %v111_v36  ;;  %v81_v44 = vld [vmem:[#allocation3 + $0x30] sm:$0xff]  ;;  %v114_v47 = vld [vmem:[#allocation3 + $0x138] sm:$0xff] }
  0x5b   :  { %2599 = vmatpush3.bf16.msra.mxu1 %v2598_v62  ;;  %2569 = vmatprep.subr.bf16.mxu0 %v2568_v63  ;;  %v2648_v62 = vpack.c.bf16 %v124_v54, %v123_v53  ;;  %v108_v63 = vld [vmem:[#allocation3 + $0x108] sm:$0xff]  ;;  %v99_v48 = vld [vmem:[#allocation3 + $0xc0] sm:$0xff]  ;;  %v101_v59 = vld [vmem:[#allocation3 + $0xd0] sm:$0xff] }
  0x5c   :  { %2601 = vmatprep.subr.bf16.mxu1 %v2600_v11  ;;  %v125_v11 = vld [vmem:[#allocation3 + $0x190] sm:$0xff]  ;;  %v2650_v16 = vpack.c.bf16 %v108_v63, %v107_v61  ;;  %v677_v31 = vcombine.high %v3179_v13, %v3179_v13  ;;  %v100_v49 = vld [vmem:[#allocation3 + $0xc8] sm:$0xff]  ;;  %v83_v54 = vld [vmem:[#allocation3 + $0x40] sm:$0xff] }
  0x5d   :  { %v2652_v24 = vpack.c.bf16 %v126_v12, %v125_v11  ;;  %v132_v50 = vld [vmem:[#allocation3 + $0x1c8] sm:$0xff]  ;;  %v2632_v53 = vpack.c.bf16 %v100_v49, %v99_v48  ;;  %v102_v60 = vld [vmem:[#allocation3 + $0xd8] sm:$0xff]  ;;  %v133_v61 = vld [vmem:[#allocation3 + $0x1d0] sm:$0xff] }
  0x5e   :  { %2571 = vmatpush3.bf16.msra.mxu0 %v2570_v20  ;;  %v77_v20 = vld [vmem:[#allocation3 + $0x10] sm:$0xff]  ;;  %v84_v55 = vld [vmem:[#allocation3 + $0x48] sm:$0xff]  ;;  %v2636_v9 = vpack.c.bf16 %v102_v60, %v101_v59  ;;  %v86_v12 = vld [vmem:[#allocation3 + $0x58] sm:$0xff] }
  0x5f   :  { %2603 = vmatpush3.bf16.msra.mxu1 %v2602_v21  ;;  %2573 = vmatprep.subr.bf16.mxu0 %v2572_v23  ;;  %v78_v21 = vld [vmem:[#allocation3 + $0x18] sm:$0xff]  ;;  %v109_v23 = vld [vmem:[#allocation3 + $0x110] sm:$0xff]  ;;  %v2634_v63 = vpack.c.bf16 %v84_v55, %v83_v54  ;;  %v88_v29 = vld [vmem:[#allocation3 + $0x68] sm:$0xff]  ;;  %v3191_v55 = vrot.slane %v3090_v1, %v3145_v14 }
  0x60   :  { %2605 = vmatprep.subr.bf16.mxu1 %v2604_v28  ;;  %v676_v28 = vcombine.high %v3176_v10, %v3176_v10  ;;  %v2622_v32 = vpack.c.bf16 %v78_v21, %v77_v20  ;;  %v2654_v33 = vpack.c.bf16 %v110_v26, %v109_v23  ;;  %v85_v11 = vld [vmem:[#allocation3 + $0x50] sm:$0xff]  ;;  %v103_v20 = vld [vmem:[#allocation3 + $0xe0] sm:$0xff]  ;;  %v104_v21 = vld [vmem:[#allocation3 + $0xe8] sm:$0xff] }
  0x61   :  { %v135_v23 = vld [vmem:[#allocation3 + $0x1e0] sm:$0xff]  ;;  %v2638_v26 = vpack.c.bf16 %v86_v12, %v85_v11  ;;  %v158_v54 = vld [vmem:[#allocation3 + $0x298] sm:$0xff] }
  0x62   :  { %2575 = vmatpush3.bf16.msra.mxu0 %v2574_v34  ;;  %v2624_v34 = vpack.c.bf16 %v96_v0, %v95_v27  ;;  %v2640_v0 = vpack.c.bf16 %v104_v21, %v103_v20  ;;  %v119_v30 = vld [vmem:[#allocation3 + $0x160] sm:$0xff]  ;;  %v174_v11 = vld [vmem:[#allocation3 + $0x318] sm:$0xff] }
  0x63   :  { %2607 = vmatpush3.bf16.msra.mxu1 %v2606_v3  ;;  %2577 = vmatprep.subr.bf16.mxu0 %v2576_v35  ;;  %v79_v3 = vld [vmem:[#allocation3 + $0x20] sm:$0xff]  ;;  %v80_v35 = vld [vmem:[#allocation3 + $0x28] sm:$0xff] }
  0x64   :  { %2609 = vmatprep.subr.bf16.mxu1 %v2608_v39  ;;  %v98_v39 = vld [vmem:[#allocation3 + $0xb8] sm:$0xff]  ;;  %v139_v49 = vld [vmem:[#allocation3 + $0x200] sm:$0xff] }
  0x65   :  { %v159_v12 = vld [vmem:[#allocation3 + $0x2a0] sm:$0xff] }
  0x66   :  { %2579 = vmatpush3.bf16.msra.mxu0 %v2578_v45  ;;  %v82_v45 = vld [vmem:[#allocation3 + $0x38] sm:$0xff] }
  0x67   :  { %2611 = vmatpush3.bf16.msra.mxu1 %v2610_v46  ;;  %2581 = vmatprep.subr.bf16.mxu0 %v2580_v18  ;;  %v113_v46 = vld [vmem:[#allocation3 + $0x130] sm:$0xff]  ;;  %v2660_v18 = vpack.c.bf16 %v130_v41, %v129_v40  ;;  %v2630_v51 = vpack.c.bf16 %v82_v45, %v81_v44  ;;  %v187_v44 = vld [vmem:[#allocation3 + $0x380] sm:$0xff]  ;;  %v188_v45 = vld [vmem:[#allocation3 + $0x388] sm:$0xff] }
  0x68   :  { %2613 = vmatprep.subr.bf16.mxu1 %v2612_v19  ;;  %v131_v19 = vld [vmem:[#allocation3 + $0x1c0] sm:$0xff]  ;;  %v2662_v52 = vpack.c.bf16 %v114_v47, %v113_v46  ;;  %v121_v40 = vld [vmem:[#allocation3 + $0x170] sm:$0xff]  ;;  %v678_v46 = vcombine.high %v3090_v1, %v3090_v1  ;;  %v160_v1 = vld [vmem:[#allocation3 + $0x2a8] sm:$0xff] }
  0x6a   :  { %2583 = vmatpush3.bf16.msra.mxu0 %v2582_v56  ;;  %v115_v56 = vld [vmem:[#allocation3 + $0x140] sm:$0xff] }
  0x6b   :  { %2615 = vmatpush3.bf16.msra.mxu1 %v2614_v57  ;;  %2617 = vmatprep.subr.bf16.mxu0 %v2616_v58  ;;  %v2664_v57 = vpack.c.bf16 %v132_v50, %v131_v19  ;;  %v116_v58 = vld [vmem:[#allocation3 + $0x148] sm:$0xff]  ;;  %v171_v50 = vld [vmem:[#allocation3 + $0x300] sm:$0xff] }
  0x6c   :  { %2649 = vmatprep.subr.bf16.mxu1 %v2648_v62  ;;  %v134_v62 = vld [vmem:[#allocation3 + $0x1d8] sm:$0xff]  ;;  %v2666_v2 = vpack.c.bf16 %v116_v58, %v115_v56  ;;  %v140_v19 = vld [vmem:[#allocation3 + $0x208] sm:$0xff]  ;;  %v189_v56 = vld [vmem:[#allocation3 + $0x390] sm:$0xff]  ;;  %v3194_v58 = vrot.slane %v678_v46, %v3145_v14 }
  0x6d   :  { %584 = vmatmul.mubr.f32.vlgmr.msra.gmra.mrb[2].mxu0 %v3161_v22  ;;  %v97_v22 = vld [vmem:[#allocation3 + $0xb0] sm:$0xff]  ;;  %v2682_v59 = vpack.c.bf16 %v140_v19, %v139_v49  ;;  %v179_v46 = vld [vmem:[#allocation3 + $0x340] sm:$0xff]  ;;  %v166_v49 = vld [vmem:[#allocation3 + $0x2d8] sm:$0xff] }
  0x6e   :  { %654 = vmatmul.mubr.f32.vlgmr.msra.gmra.mrb[2].mxu1 %v3164_v25  ;;  %2619 = vmatpush3.bf16.msra.mxu0 %v2618_v15  ;;  %v2626_v25 = vpack.c.bf16 %v80_v35, %v79_v3  ;;  %v2628_v43 = vpack.c.bf16 %v98_v39, %v97_v22  ;;  %v117_v15 = vld [vmem:[#allocation3 + $0x150] sm:$0xff]  ;;  %v138_v35 = vld [vmem:[#allocation3 + $0x1f8] sm:$0xff]  ;;  %v694_v20 = vcombine.high %v3194_v58, %v3194_v58 }
  0x6f   :  { %2651 = vmatpush3.bf16.msra.mxu1 %v2650_v16  ;;  %2621 = vmatprep.subr.bf16.mxu0 %v2620_v17  ;;  %v2668_v16 = vpack.c.bf16 %v134_v62, %v133_v61  ;;  %v118_v17 = vld [vmem:[#allocation3 + $0x158] sm:$0xff]  ;;  %v137_v3 = vld [vmem:[#allocation3 + $0x1f0] sm:$0xff] }
  0x70   :  { %2653 = vmatprep.subr.bf16.mxu1 %v2652_v24  ;;  %767 = vmatprep.mubr.f32.mxu0 %v676_v28  ;;  %v136_v24 = vld [vmem:[#allocation3 + $0x1e8] sm:$0xff]  ;;  %v2670_v27 = vpack.c.bf16 %v118_v17, %v117_v15  ;;  %v87_v28 = vld [vmem:[#allocation3 + $0x60] sm:$0xff]  ;;  %v89_v22 = vld [vmem:[#allocation3 + $0x70] sm:$0xff]  ;;  %v2676_v41 = vpack.c.bf16 %v138_v35, %v137_v3  ;;  %v693_v15 = vcombine.high %v3191_v55, %v3191_v55 }
  0x71   :  { %837 = vmatprep.mubr.f32.mxu1 %v677_v31  ;;  %v2672_v31 = vpack.c.bf16 %v136_v24, %v135_v23  ;;  %v2642_v36 = vpack.c.bf16 %v88_v29, %v87_v28  ;;  %v90_v39 = vld [vmem:[#allocation3 + $0x78] sm:$0xff]  ;;  %v141_v62 = vld [vmem:[#allocation3 + $0x210] sm:$0xff]  ;;  %v192_v17 = vld [vmem:[#allocation3 + $0x3a8] sm:$0xff]  ;;  %v2688_v24 = vpack.c.bf16 %v160_v1, %v159_v12 }
  0x72   :  { %2623 = vmatpush3.bf16.msra.mxu0 %v2622_v32  ;;  %v120_v32 = vld [vmem:[#allocation3 + $0x168] sm:$0xff]  ;;  %v145_v3 = vld [vmem:[#allocation3 + $0x230] sm:$0xff]  ;;  %v146_v35 = vld [vmem:[#allocation3 + $0x238] sm:$0xff] }
  0x73   :  { %2655 = vmatpush3.bf16.msra.mxu1 %v2654_v33  ;;  %2625 = vmatprep.subr.bf16.mxu0 %v2624_v34  ;;  %v105_v33 = vld [vmem:[#allocation3 + $0xf0] sm:$0xff]  ;;  %v106_v34 = vld [vmem:[#allocation3 + $0xf8] sm:$0xff]  ;;  %v176_v29 = vld [vmem:[#allocation3 + $0x328] sm:$0xff] }
  0x74   :  { %2657 = vmatprep.subr.bf16.mxu1 %v2656_v37  ;;  %v2674_v37 = vpack.c.bf16 %v120_v32, %v119_v30  ;;  %v2644_v38 = vpack.c.bf16 %v106_v34, %v105_v33  ;;  %v162_v30 = vld [vmem:[#allocation3 + $0x2b8] sm:$0xff]  ;;  %v197_v19 = vld [vmem:[#allocation3 + $0x3d0] sm:$0xff]  ;;  %v151_v1 = vld [vmem:[#allocation3 + $0x260] sm:$0xff] }
  0x75   :  { %v194_v32 = vld [vmem:[#allocation3 + $0x3b8] sm:$0xff] }
  0x76   :  { %2627 = vmatpush3.bf16.msra.mxu0 %v2626_v25  ;;  %v122_v25 = vld [vmem:[#allocation3 + $0x178] sm:$0xff] }
  0x77   :  { %2659 = vmatpush3.bf16.msra.mxu1 %v2658_v42  ;;  %2629 = vmatprep.subr.bf16.mxu0 %v2628_v43  ;;  %v155_v42 = vld [vmem:[#allocation3 + $0x280] sm:$0xff]  ;;  %v156_v43 = vld [vmem:[#allocation3 + $0x288] sm:$0xff]  ;;  %v2678_v47 = vpack.c.bf16 %v122_v25, %v121_v40  ;;  %v2694_v25 = vpack.c.bf16 %v146_v35, %v145_v3  ;;  %v1117_v35 = vcombine.high %v3103_v4, %v3103_v4 }
  0x78   :  { %2661 = vmatprep.subr.bf16.mxu1 %v2660_v18  ;;  %v2646_v18 = vpack.c.bf16 %v90_v39, %v89_v22  ;;  %v2680_v48 = vpack.c.bf16 %v156_v43, %v155_v42  ;;  %v163_v22 = vld [vmem:[#allocation3 + $0x2c0] sm:$0xff]  ;;  %v164_v39 = vld [vmem:[#allocation3 + $0x2c8] sm:$0xff] }
  0x79   :  { %v195_v40 = vld [vmem:[#allocation3 + $0x3c0] sm:$0xff]  ;;  %v2696_v43 = vpack.c.bf16 %v164_v39, %v163_v22  ;;  %v1036_v3 = vld [vmem:[#allocation3 + $0x988] sm:$0xff] }
  0x7a   :  { %2631 = vmatpush3.bf16.msra.mxu0 %v2630_v51  ;;  %v2712_v51 = vpack.c.bf16 %v188_v45, %v187_v44  ;;  %v147_v44 = vld [vmem:[#allocation3 + $0x240] sm:$0xff]  ;;  %v148_v45 = vld [vmem:[#allocation3 + $0x248] sm:$0xff] }
  0x7b   :  { %2663 = vmatpush3.bf16.msra.mxu1 %v2662_v52  ;;  %2633 = vmatprep.subr.bf16.mxu0 %v2632_v53  ;;  %v172_v52 = vld [vmem:[#allocation3 + $0x308] sm:$0xff]  ;;  %v157_v53 = vld [vmem:[#allocation3 + $0x290] sm:$0xff]  ;;  %v987_v22 = vld [vmem:[#allocation3 + $0x800] sm:$0xff] }
  0x7c   :  { %2665 = vmatprep.subr.bf16.mxu1 %v2664_v57  ;;  %v190_v57 = vld [vmem:[#allocation3 + $0x398] sm:$0xff]  ;;  %v2714_v60 = vpack.c.bf16 %v172_v52, %v171_v50  ;;  %v2684_v61 = vpack.c.bf16 %v158_v54, %v157_v53  ;;  %v149_v54 = vld [vmem:[#allocation3 + $0x250] sm:$0xff]  ;;  %v988_v39 = vld [vmem:[#allocation3 + $0x808] sm:$0xff] }
  0x7d   :  { %v198_v50 = vld [vmem:[#allocation3 + $0x3d8] sm:$0xff] }
  0x7e   :  { %2635 = vmatpush3.bf16.msra.mxu0 %v2634_v63  ;;  %v142_v63 = vld [vmem:[#allocation3 + $0x218] sm:$0xff] }
  0x7f   :  { %2667 = vmatpush3.bf16.msra.mxu1 %v2666_v2  ;;  %2637 = vmatprep.subr.bf16.mxu0 %v2636_v9  ;;  %v173_v2 = vld [vmem:[#allocation3 + $0x310] sm:$0xff]  ;;  %v2716_v9 = vpack.c.bf16 %v190_v57, %v189_v56  ;;  %v2686_v21 = vpack.c.bf16 %v142_v63, %v141_v62  ;;  %v150_v56 = vld [vmem:[#allocation3 + $0x258] sm:$0xff]  ;;  %v168_v62 = vld [vmem:[#allocation3 + $0x2e8] sm:$0xff] }
  0x80   :  { %2669 = vmatprep.subr.bf16.mxu1 %v2668_v16  ;;  %v191_v16 = vld [vmem:[#allocation3 + $0x3a0] sm:$0xff]  ;;  %v2718_v23 = vpack.c.bf16 %v174_v11, %v173_v2  ;;  %v181_v57 = vld [vmem:[#allocation3 + $0x350] sm:$0xff]  ;;  %v200_v2 = vld [vmem:[#allocation3 + $0x3e8] sm:$0xff] }
  0x81   :  { %v2720_v28 = vpack.c.bf16 %v192_v17, %v191_v16  ;;  %v199_v63 = vld [vmem:[#allocation3 + $0x3e0] sm:$0xff] }
  0x82   :  { %2639 = vmatpush3.bf16.msra.mxu0 %v2638_v26  ;;  %v143_v26 = vld [vmem:[#allocation3 + $0x220] sm:$0xff]  ;;  %v2736_v17 = vpack.c.bf16 %v200_v2, %v199_v63 }
  0x83   :  { %2671 = vmatpush3.bf16.msra.mxu1 %v2670_v27  ;;  %2641 = vmatprep.subr.bf16.mxu0 %v2640_v0  ;;  %v144_v27 = vld [vmem:[#allocation3 + $0x228] sm:$0xff]  ;;  %v175_v0 = vld [vmem:[#allocation3 + $0x320] sm:$0xff] }
  0x84   :  { %2673 = vmatprep.subr.bf16.mxu1 %v2672_v31  ;;  %v193_v31 = vld [vmem:[#allocation3 + $0x3b0] sm:$0xff]  ;;  %v2722_v33 = vpack.c.bf16 %v176_v29, %v175_v0  ;;  %v183_v16 = vld [vmem:[#allocation3 + $0x360] sm:$0xff] }
  0x85   :  { %v153_v29 = vld [vmem:[#allocation3 + $0x270] sm:$0xff]  ;;  %v991_v2 = vld [vmem:[#allocation3 + $0x820] sm:$0xff] }
  0x86   :  { %2643 = vmatpush3.bf16.msra.mxu0 %v2642_v36  ;;  %v177_v36 = vld [vmem:[#allocation3 + $0x330] sm:$0xff] }
  0x87   :  { %2675 = vmatpush3.bf16.msra.mxu1 %v2674_v37  ;;  %2645 = vmatprep.subr.bf16.mxu0 %v2644_v38  ;;  %v2724_v37 = vpack.c.bf16 %v194_v32, %v193_v31  ;;  %v178_v38 = vld [vmem:[#allocation3 + $0x338] sm:$0xff] }
  0x88   :  { %2677 = vmatprep.subr.bf16.mxu1 %v2676_v41  ;;  %v196_v41 = vld [vmem:[#allocation3 + $0x3c8] sm:$0xff]  ;;  %v2726_v42 = vpack.c.bf16 %v178_v38, %v177_v36  ;;  %v186_v32 = vld [vmem:[#allocation3 + $0x378] sm:$0xff] }
  0x8a   :  { %2647 = vmatpush3.bf16.msra.mxu0 %v2646_v18  ;;  %v2728_v18 = vpack.c.bf16 %v196_v41, %v195_v40  ;;  %v1019_v40 = vld [vmem:[#allocation3 + $0x900] sm:$0xff] }
  0x8b   :  { %2679 = vmatpush3.bf16.msra.mxu1 %v2678_v47  ;;  %2681 = vmatprep.subr.bf16.mxu0 %v2680_v48  ;;  %v180_v47 = vld [vmem:[#allocation3 + $0x348] sm:$0xff]  ;;  %v165_v48 = vld [vmem:[#allocation3 + $0x2d0] sm:$0xff] }
  0x8c   :  { %2713 = vmatprep.subr.bf16.mxu1 %v2712_v51  ;;  %v2698_v51 = vpack.c.bf16 %v148_v45, %v147_v44  ;;  %v2730_v52 = vpack.c.bf16 %v180_v47, %v179_v46  ;;  %v2700_v53 = vpack.c.bf16 %v166_v49, %v165_v48  ;;  %v3206_v44 = vrot.slane %v3103_v4, %v3145_v14  ;;  %v1037_v45 = vld [vmem:[#allocation3 + $0x990] sm:$0xff]  ;;  %v1038_v46 = vld [vmem:[#allocation3 + $0x998] sm:$0xff]  ;;  %v1008_v4 = vld [vmem:[#allocation3 + $0x8a8] sm:$0xff] }
  0x8d   :  { %768 = vmatmul.mubr.f32.vlgmr.msra.gmra.mrb[4].mxu0 %v3176_v10  ;;  %v161_v10 = vld [vmem:[#allocation3 + $0x2b0] sm:$0xff]  ;;  %v2746_v47 = vpack.c.bf16 %v988_v39, %v987_v22  ;;  %v1046_v39 = vld [vmem:[#allocation3 + $0x9d8] sm:$0xff] }
  0x8e   :  { %838 = vmatmul.mubr.f32.vlgmr.msra.gmra.mrb[4].mxu1 %v3179_v13  ;;  %2683 = vmatpush3.bf16.msra.mxu0 %v2682_v59  ;;  %v2690_v13 = vpack.c.bf16 %v144_v27, %v143_v26  ;;  %v2692_v34 = vpack.c.bf16 %v162_v30, %v161_v10  ;;  %v2732_v59 = vpack.c.bf16 %v198_v50, %v197_v19  ;;  %v202_v26 = vld [vmem:[#allocation3 + $0x3f8] sm:$0xff]  ;;  %v185_v30 = vld [vmem:[#allocation3 + $0x370] sm:$0xff] }
  0x8f   :  { %2715 = vmatpush3.bf16.msra.mxu1 %v2714_v60  ;;  %2685 = vmatprep.subr.bf16.mxu0 %v2684_v61  ;;  %v182_v60 = vld [vmem:[#allocation3 + $0x358] sm:$0xff]  ;;  %v167_v61 = vld [vmem:[#allocation3 + $0x2e0] sm:$0xff]  ;;  %v989_v19 = vld [vmem:[#allocation3 + $0x810] sm:$0xff] }
  0x90   :  { %2717 = vmatprep.subr.bf16.mxu1 %v2716_v9  ;;  %907 = vmatprep.mubr.f32.mxu0 %v693_v15  ;;  %v2702_v9 = vpack.c.bf16 %v150_v56, %v149_v54  ;;  %v2734_v11 = vpack.c.bf16 %v182_v60, %v181_v57  ;;  %v2704_v12 = vpack.c.bf16 %v168_v62, %v167_v61  ;;  %v152_v15 = vld [vmem:[#allocation3 + $0x268] sm:$0xff]  ;;  %v154_v10 = vld [vmem:[#allocation3 + $0x278] sm:$0xff]  ;;  %v1007_v54 = vld [vmem:[#allocation3 + $0x8a0] sm:$0xff] }
  0x91   :  { %977 = vmatprep.mubr.f32.mxu1 %v694_v20  ;;  %v184_v20 = vld [vmem:[#allocation3 + $0x368] sm:$0xff]  ;;  %v2706_v27 = vpack.c.bf16 %v152_v15, %v151_v1  ;;  %v2710_v36 = vpack.c.bf16 %v154_v10, %v153_v29  ;;  %v990_v50 = vld [vmem:[#allocation3 + $0x818] sm:$0xff]  ;;  %v1132_v56 = vcombine.high %v3206_v44, %v3206_v44  ;;  %v1039_v57 = vld [vmem:[#allocation3 + $0x9a0] sm:$0xff]  ;;  %v2752_v63 = vpack.c.bf16 %v1008_v4, %v1007_v54 }
  0x92   :  { %2687 = vmatpush3.bf16.msra.mxu0 %v2686_v21  ;;  %v169_v21 = vld [vmem:[#allocation3 + $0x2f0] sm:$0xff]  ;;  %v2738_v0 = vpack.c.bf16 %v184_v20, %v183_v16  ;;  %v2750_v61 = vpack.c.bf16 %v990_v50, %v989_v19  ;;  %v1024_v1 = vld [vmem:[#allocation3 + $0x928] sm:$0xff]  ;;  %v1010_v15 = vld [vmem:[#allocation3 + $0x8b8] sm:$0xff] }
  0x93   :  { %2719 = vmatpush3.bf16.msra.mxu1 %v2718_v23  ;;  %2689 = vmatprep.subr.bf16.mxu0 %v2688_v24  ;;  %v170_v23 = vld [vmem:[#allocation3 + $0x2f8] sm:$0xff]  ;;  %v201_v24 = vld [vmem:[#allocation3 + $0x3f0] sm:$0xff]  ;;  %v1012_v29 = vld [vmem:[#allocation3 + $0x8c8] sm:$0xff] }
  0x94   :  { %2721 = vmatprep.subr.bf16.mxu1 %v2720_v28  ;;  %v2708_v28 = vpack.c.bf16 %v170_v23, %v169_v21  ;;  %v2740_v31 = vpack.c.bf16 %v202_v26, %v201_v24  ;;  %v1041_v16 = vld [vmem:[#allocation3 + $0x9b0] sm:$0xff]  ;;  %v994_v24 = vld [vmem:[#allocation3 + $0x838] sm:$0xff]  ;;  %v1043_v10 = vld [vmem:[#allocation3 + $0x9c0] sm:$0xff] }
  0x95   :  { %v993_v23 = vld [vmem:[#allocation3 + $0x830] sm:$0xff]  ;;  %v1047_v19 = vld [vmem:[#allocation3 + $0x9e0] sm:$0xff]  ;;  %v1048_v50 = vld [vmem:[#allocation3 + $0x9e8] sm:$0xff] }
  0x96   :  { %2691 = vmatpush3.bf16.msra.mxu0 %v2690_v13  ;;  %v1003_v13 = vld [vmem:[#allocation3 + $0x880] sm:$0xff]  ;;  %v1025_v26 = vld [vmem:[#allocation3 + $0x930] sm:$0xff]  ;;  %v1000_v4 = vld [vmem:[#allocation3 + $0x868] sm:$0xff] }
  0x97   :  { %2723 = vmatpush3.bf16.msra.mxu1 %v2722_v33  ;;  %2693 = vmatprep.subr.bf16.mxu0 %v2692_v34  ;;  %v1004_v33 = vld [vmem:[#allocation3 + $0x888] sm:$0xff]  ;;  %v1035_v34 = vld [vmem:[#allocation3 + $0x980] sm:$0xff]  ;;  %v1045_v22 = vld [vmem:[#allocation3 + $0x9d0] sm:$0xff] }
  0x98   :  { %2725 = vmatprep.subr.bf16.mxu1 %v2724_v37  ;;  %v2742_v37 = vpack.c.bf16 %v186_v32, %v185_v30  ;;  %v2744_v38 = vpack.c.bf16 %v1004_v33, %v1003_v13  ;;  %v2776_v41 = vpack.c.bf16 %v1036_v3, %v1035_v34  ;;  %v1044_v30 = vld [vmem:[#allocation3 + $0x9c8] sm:$0xff]  ;;  %v995_v33 = vld [vmem:[#allocation3 + $0x840] sm:$0xff] }
  0x99   :  { %v996_v34 = vld [vmem:[#allocation3 + $0x848] sm:$0xff]  ;;  %v1027_v3 = vld [vmem:[#allocation3 + $0x940] sm:$0xff] }
  0x9a   :  { %2695 = vmatpush3.bf16.msra.mxu0 %v2694_v25  ;;  %v1020_v25 = vld [vmem:[#allocation3 + $0x908] sm:$0xff]  ;;  %v999_v54 = vld [vmem:[#allocation3 + $0x860] sm:$0xff] }
  0x9b   :  { %2727 = vmatpush3.bf16.msra.mxu1 %v2726_v42  ;;  %2697 = vmatprep.subr.bf16.mxu0 %v2696_v43  ;;  %v1005_v42 = vld [vmem:[#allocation3 + $0x890] sm:$0xff]  ;;  %v1006_v43 = vld [vmem:[#allocation3 + $0x898] sm:$0xff]  ;;  %v2778_v48 = vpack.c.bf16 %v1020_v25, %v1019_v40  ;;  %v2762_v40 = vpack.c.bf16 %v996_v34, %v995_v33 }
  0x9c   :  { %2729 = vmatprep.subr.bf16.mxu1 %v2728_v18  ;;  %v3209_v18 = vrot.slane %v1117_v35, %v3145_v14  ;;  %v2748_v49 = vpack.c.bf16 %v1006_v43, %v1005_v42  ;;  %v2792_v35 = vpack.c.bf16 %v1044_v30, %v1043_v10  ;;  %v997_v42 = vld [vmem:[#allocation3 + $0x850] sm:$0xff]  ;;  %v998_v43 = vld [vmem:[#allocation3 + $0x858] sm:$0xff]  ;;  %v1084_v30 = vld [vmem:[#allocation3 + $0xb08] sm:$0xff] }
  0x9d   :  { %v1101_v33 = vld [vmem:[#allocation3 + $0xb90] sm:$0xff]  ;;  %v1102_v34 = vld [vmem:[#allocation3 + $0xb98] sm:$0xff] }
  0x9e   :  { %2699 = vmatpush3.bf16.msra.mxu0 %v2698_v51  ;;  %v1021_v51 = vld [vmem:[#allocation3 + $0x910] sm:$0xff]  ;;  %v1133_v60 = vcombine.high %v3209_v18, %v3209_v18 }
  0x9f   :  { %2731 = vmatpush3.bf16.msra.mxu1 %v2730_v52  ;;  %2701 = vmatprep.subr.bf16.mxu0 %v2700_v53  ;;  %v2780_v52 = vpack.c.bf16 %v1038_v46, %v1037_v45  ;;  %v1022_v53 = vld [vmem:[#allocation3 + $0x918] sm:$0xff]  ;;  %v1029_v45 = vld [vmem:[#allocation3 + $0x950] sm:$0xff]  ;;  %v2796_v46 = vpack.c.bf16 %v1046_v39, %v1045_v22 }
  0xa0   :  { %2733 = vmatprep.subr.bf16.mxu1 %v2732_v59  ;;  %v1040_v59 = vld [vmem:[#allocation3 + $0x9a8] sm:$0xff]  ;;  %v2782_v62 = vpack.c.bf16 %v1022_v53, %v1021_v51  ;;  %v2766_v51 = vpack.c.bf16 %v998_v43, %v997_v42  ;;  %v1054_v22 = vld [vmem:[#allocation3 + $0xa18] sm:$0xff]  ;;  %v1085_v39 = vld [vmem:[#allocation3 + $0xb10] sm:$0xff] }
  0xa1   :  { %v1103_v43 = vld [vmem:[#allocation3 + $0xba0] sm:$0xff] }
  0xa2   :  { %2703 = vmatpush3.bf16.msra.mxu0 %v2702_v9  ;;  %v992_v9 = vld [vmem:[#allocation3 + $0x828] sm:$0xff] }
  0xa3   :  { %2735 = vmatpush3.bf16.msra.mxu1 %v2734_v11  ;;  %2705 = vmatprep.subr.bf16.mxu0 %v2704_v12  ;;  %v1023_v11 = vld [vmem:[#allocation3 + $0x920] sm:$0xff]  ;;  %v2784_v12 = vpack.c.bf16 %v1040_v59, %v1039_v57  ;;  %v2800_v57 = vpack.c.bf16 %v1048_v50, %v1047_v19  ;;  %v1032_v59 = vld [vmem:[#allocation3 + $0x968] sm:$0xff] }
  0xa4   :  { %2737 = vmatprep.subr.bf16.mxu1 %v2736_v17  ;;  %v1042_v17 = vld [vmem:[#allocation3 + $0x9b8] sm:$0xff]  ;;  %v2786_v20 = vpack.c.bf16 %v1024_v1, %v1023_v11  ;;  %v1055_v19 = vld [vmem:[#allocation3 + $0xa20] sm:$0xff]  ;;  %v1056_v50 = vld [vmem:[#allocation3 + $0xa28] sm:$0xff] }
  0xa5   :  { %v1002_v1 = vld [vmem:[#allocation3 + $0x878] sm:$0xff] }
  0xa6   :  { %2707 = vmatpush3.bf16.msra.mxu0 %v2706_v27  ;;  %v2788_v27 = vpack.c.bf16 %v1042_v17, %v1041_v16  ;;  %v1034_v16 = vld [vmem:[#allocation3 + $0x978] sm:$0xff]  ;;  %v1067_v17 = vld [vmem:[#allocation3 + $0xa80] sm:$0xff] }
  0xa7   :  { %2739 = vmatpush3.bf16.msra.mxu1 %v2738_v0  ;;  %2709 = vmatprep.subr.bf16.mxu0 %v2708_v28  ;;  %v1026_v0 = vld [vmem:[#allocation3 + $0x938] sm:$0xff]  ;;  %v1011_v28 = vld [vmem:[#allocation3 + $0x8c0] sm:$0xff] }
  0xa8   :  { %2741 = vmatprep.subr.bf16.mxu1 %v2740_v31  ;;  %v2758_v31 = vpack.c.bf16 %v994_v24, %v993_v23  ;;  %v2790_v32 = vpack.c.bf16 %v1026_v0, %v1025_v26  ;;  %v2760_v13 = vpack.c.bf16 %v1012_v29, %v1011_v28  ;;  %v1134_v23 = vcombine.high %v3108_v5, %v3108_v5  ;;  %v1051_v0 = vld [vmem:[#allocation3 + $0xa00] sm:$0xff]  ;;  %v1052_v28 = vld [vmem:[#allocation3 + $0xa08] sm:$0xff] }
  0xa9   :  { %v1083_v29 = vld [vmem:[#allocation3 + $0xb00] sm:$0xff] }
  0xaa   :  { %2711 = vmatpush3.bf16.msra.mxu0 %v2710_v36  ;;  %v1028_v36 = vld [vmem:[#allocation3 + $0x948] sm:$0xff] }
  0xab   :  { %2743 = vmatpush3.bf16.msra.mxu1 %v2742_v37  ;;  %2745 = vmatprep.subr.bf16.mxu0 %v2744_v38  ;;  %v1013_v37 = vld [vmem:[#allocation3 + $0x8d0] sm:$0xff]  ;;  %v1014_v38 = vld [vmem:[#allocation3 + $0x8d8] sm:$0xff] }
  0xac   :  { %2777 = vmatprep.subr.bf16.mxu1 %v2776_v41  ;;  %v2794_v41 = vpack.c.bf16 %v1028_v36, %v1027_v3  ;;  %v2764_v25 = vpack.c.bf16 %v1014_v38, %v1013_v37  ;;  %v3224_v3 = vrot.slane %v1134_v23, %v3145_v14  ;;  %v2842_v36 = vpack.c.bf16 %v1084_v30, %v1083_v29  ;;  %v1053_v38 = vld [vmem:[#allocation3 + $0xa10] sm:$0xff]  ;;  %v1092_v23 = vld [vmem:[#allocation3 + $0xb48] sm:$0xff] }
  0xad   :  { %908 = vmatmul.mubr.f32.vlgmr.msra.gmra.mrb[6].mxu0 %v3191_v55  ;;  %v1009_v55 = vld [vmem:[#allocation3 + $0x8b0] sm:$0xff] }
  0xae   :  { %978 = vmatmul.mubr.f32.vlgmr.msra.gmra.mrb[6].mxu1 %v3194_v58  ;;  %2747 = vmatpush3.bf16.msra.mxu0 %v2746_v47  ;;  %v2754_v58 = vpack.c.bf16 %v992_v9, %v991_v2  ;;  %v2756_v21 = vpack.c.bf16 %v1010_v15, %v1009_v55  ;;  %v1030_v47 = vld [vmem:[#allocation3 + $0x958] sm:$0xff]  ;;  %v2770_v2 = vpack.c.bf16 %v1000_v4, %v999_v54  ;;  %v1033_v55 = vld [vmem:[#allocation3 + $0x970] sm:$0xff] }
  0xaf   :  { %2779 = vmatpush3.bf16.msra.mxu1 %v2778_v48  ;;  %2749 = vmatprep.subr.bf16.mxu0 %v2748_v49  ;;  %v1015_v48 = vld [vmem:[#allocation3 + $0x8e0] sm:$0xff]  ;;  %v1016_v49 = vld [vmem:[#allocation3 + $0x8e8] sm:$0xff]  ;;  %v2806_v26 = vpack.c.bf16 %v1034_v16, %v1033_v55  ;;  %v1074_v54 = vld [vmem:[#allocation3 + $0xab8] sm:$0xff] }
  0xb0   :  { %2781 = vmatprep.subr.bf16.mxu1 %v2780_v52  ;;  %1223 = vmatprep.mubr.f32.mxu0 %v1132_v56  ;;  %v2798_v52 = vpack.c.bf16 %v1030_v47, %v1029_v45  ;;  %v2768_v53 = vpack.c.bf16 %v1016_v49, %v1015_v48  ;;  %v1031_v56 = vld [vmem:[#allocation3 + $0x960] sm:$0xff]  ;;  %v1104_v45 = vld [vmem:[#allocation3 + $0xba8] sm:$0xff]  ;;  %v2814_v47 = vpack.c.bf16 %v1054_v22, %v1053_v38  ;;  %v1105_v4 = vld [vmem:[#allocation3 + $0xbb0] sm:$0xff] }
  0xb1   :  { %1293 = vmatprep.mubr.f32.mxu1 %v1133_v60  ;;  %v1017_v60 = vld [vmem:[#allocation3 + $0x8f0] sm:$0xff]  ;;  %v2802_v9 = vpack.c.bf16 %v1032_v59, %v1031_v56  ;;  %v1106_v56 = vld [vmem:[#allocation3 + $0xbb8] sm:$0xff]  ;;  %v1112_v38 = vld [vmem:[#allocation3 + $0xbe8] sm:$0xff] }
  0xb2   :  { %2751 = vmatpush3.bf16.msra.mxu0 %v2750_v61  ;;  %v1018_v61 = vld [vmem:[#allocation3 + $0x8f8] sm:$0xff]  ;;  %v1061_v30 = vld [vmem:[#allocation3 + $0xa50] sm:$0xff] }
  0xb3   :  { %2783 = vmatpush3.bf16.msra.mxu1 %v2782_v62  ;;  %2753 = vmatprep.subr.bf16.mxu0 %v2752_v63  ;;  %v1049_v62 = vld [vmem:[#allocation3 + $0x9f0] sm:$0xff]  ;;  %v1050_v63 = vld [vmem:[#allocation3 + $0x9f8] sm:$0xff]  ;;  %v2772_v11 = vpack.c.bf16 %v1018_v61, %v1017_v60 }
  0xb4   :  { %2785 = vmatprep.subr.bf16.mxu1 %v2784_v12  ;;  %v1001_v12 = vld [vmem:[#allocation3 + $0x870] sm:$0xff]  ;;  %v2804_v15 = vpack.c.bf16 %v1050_v63, %v1049_v62  ;;  %v1058_v61 = vld [vmem:[#allocation3 + $0xa38] sm:$0xff]  ;;  %v2852_v63 = vpack.c.bf16 %v1106_v56, %v1105_v4  ;;  %v1460_v4 = vld [vmem:[#allocation3 + $0xc80] sm:$0xff] }
  0xb5   :  { %v2774_v24 = vpack.c.bf16 %v1002_v1, %v1001_v12  ;;  %v1057_v60 = vld [vmem:[#allocation3 + $0xa30] sm:$0xff]  ;;  %v1107_v12 = vld [vmem:[#allocation3 + $0xbc0] sm:$0xff]  ;;  %v1108_v1 = vld [vmem:[#allocation3 + $0xbc8] sm:$0xff] }
  0xb6   :  { %2755 = vmatpush3.bf16.msra.mxu0 %v2754_v58  ;;  %v1068_v58 = vld [vmem:[#allocation3 + $0xa88] sm:$0xff]  ;;  %v1089_v62 = vld [vmem:[#allocation3 + $0xb30] sm:$0xff]  ;;  %v2822_v55 = vpack.c.bf16 %v1058_v61, %v1057_v60 }
  0xb7   :  { %2787 = vmatpush3.bf16.msra.mxu1 %v2786_v20  ;;  %2757 = vmatprep.subr.bf16.mxu0 %v2756_v21  ;;  %v1099_v20 = vld [vmem:[#allocation3 + $0xb80] sm:$0xff]  ;;  %v1100_v21 = vld [vmem:[#allocation3 + $0xb88] sm:$0xff] }
  0xb8   :  { %2789 = vmatprep.subr.bf16.mxu1 %v2788_v27  ;;  %v2808_v27 = vpack.c.bf16 %v1068_v58, %v1067_v17  ;;  %v2840_v10 = vpack.c.bf16 %v1100_v21, %v1099_v20  ;;  %v1059_v17 = vld [vmem:[#allocation3 + $0xa40] sm:$0xff]  ;;  %v1060_v58 = vld [vmem:[#allocation3 + $0xa48] sm:$0xff]  ;;  %v2856_v21 = vpack.c.bf16 %v1108_v1, %v1107_v12  ;;  %v1462_v1 = vld [vmem:[#allocation3 + $0xc90] sm:$0xff] }
  0xb9   :  { %v1091_v20 = vld [vmem:[#allocation3 + $0xb40] sm:$0xff]  ;;  %v1461_v56 = vld [vmem:[#allocation3 + $0xc88] sm:$0xff] }
  0xba   :  { %2759 = vmatpush3.bf16.msra.mxu0 %v2758_v31  ;;  %v1069_v31 = vld [vmem:[#allocation3 + $0xa90] sm:$0xff]  ;;  %v2858_v29 = vpack.c.bf16 %v1092_v23, %v1091_v20  ;;  %v1477_v12 = vld [vmem:[#allocation3 + $0xd08] sm:$0xff] }
  0xbb   :  { %2791 = vmatpush3.bf16.msra.mxu1 %v2790_v32  ;;  %2761 = vmatprep.subr.bf16.mxu0 %v2760_v13  ;;  %v1070_v32 = vld [vmem:[#allocation3 + $0xa98] sm:$0xff]  ;;  %v3221_v13 = vrot.slane %v3108_v5, %v3145_v14  ;;  %v1072_v5 = vld [vmem:[#allocation3 + $0xaa8] sm:$0xff] }
  0xbc   :  { %2793 = vmatprep.subr.bf16.mxu1 %v2792_v35  ;;  %v2810_v35 = vpack.c.bf16 %v1052_v28, %v1051_v0  ;;  %v2812_v37 = vpack.c.bf16 %v1070_v32, %v1069_v31  ;;  %v1110_v0 = vld [vmem:[#allocation3 + $0xbd8] sm:$0xff]  ;;  %v2826_v28 = vpack.c.bf16 %v1060_v58, %v1059_v17  ;;  %v1093_v32 = vld [vmem:[#allocation3 + $0xb50] sm:$0xff] }
  0xbd   :  { %v1149_v42 = vcombine.high %v3221_v13, %v3221_v13  ;;  %v1062_v31 = vld [vmem:[#allocation3 + $0xa58] sm:$0xff] }
  0xbe   :  { %2763 = vmatpush3.bf16.msra.mxu0 %v2762_v40  ;;  %v2844_v40 = vpack.c.bf16 %v1102_v34, %v1101_v33  ;;  %v1094_v34 = vld [vmem:[#allocation3 + $0xb58] sm:$0xff]  ;;  %v2830_v22 = vpack.c.bf16 %v1062_v31, %v1061_v30  ;;  %v1496_v30 = vld [vmem:[#allocation3 + $0xda0] sm:$0xff]  ;;  %v1497_v31 = vld [vmem:[#allocation3 + $0xda8] sm:$0xff] }
  0xbf   :  { %2795 = vmatpush3.bf16.msra.mxu1 %v2794_v41  ;;  %2765 = vmatprep.subr.bf16.mxu0 %v2764_v25  ;;  %v1086_v41 = vld [vmem:[#allocation3 + $0xb18] sm:$0xff]  ;;  %v1071_v25 = vld [vmem:[#allocation3 + $0xaa0] sm:$0xff] }
  0xc0   :  { %2797 = vmatprep.subr.bf16.mxu1 %v2796_v46  ;;  %v1150_v46 = vcombine.high %v3224_v3, %v3224_v3  ;;  %v2846_v48 = vpack.c.bf16 %v1086_v41, %v1085_v39  ;;  %v2816_v49 = vpack.c.bf16 %v1072_v5, %v1071_v25  ;;  %v2862_v39 = vpack.c.bf16 %v1094_v34, %v1093_v32  ;;  %v1063_v41 = vld [vmem:[#allocation3 + $0xa60] sm:$0xff]  ;;  %v1064_v25 = vld [vmem:[#allocation3 + $0xa68] sm:$0xff]  ;;  %v1495_v17 = vld [vmem:[#allocation3 + $0xd98] sm:$0xff] }
  0xc1   :  { %v1095_v5 = vld [vmem:[#allocation3 + $0xb60] sm:$0xff] }
  0xc2   :  { %2767 = vmatpush3.bf16.msra.mxu0 %v2766_v51  ;;  %v1087_v51 = vld [vmem:[#allocation3 + $0xb20] sm:$0xff] }
  0xc3   :  { %2799 = vmatpush3.bf16.msra.mxu1 %v2798_v52  ;;  %2769 = vmatprep.subr.bf16.mxu0 %v2768_v53  ;;  %v2848_v52 = vpack.c.bf16 %v1104_v45, %v1103_v43  ;;  %v1088_v53 = vld [vmem:[#allocation3 + $0xb28] sm:$0xff]  ;;  %v1081_v45 = vld [vmem:[#allocation3 + $0xaf0] sm:$0xff] }
  0xc4   :  { %2801 = vmatprep.subr.bf16.mxu1 %v2800_v57  ;;  %v2850_v57 = vpack.c.bf16 %v1088_v53, %v1087_v51  ;;  %v1096_v43 = vld [vmem:[#allocation3 + $0xb68] sm:$0xff]  ;;  %v1065_v51 = vld [vmem:[#allocation3 + $0xa70] sm:$0xff] }
  0xc5   :  { %v1097_v53 = vld [vmem:[#allocation3 + $0xb70] sm:$0xff] }
  0xc6   :  { %2771 = vmatpush3.bf16.msra.mxu0 %v2770_v2  ;;  %v1090_v2 = vld [vmem:[#allocation3 + $0xb38] sm:$0xff] }
  0xc7   :  { %2803 = vmatpush3.bf16.msra.mxu1 %v2802_v9  ;;  %2773 = vmatprep.subr.bf16.mxu0 %v2772_v11  ;;  %v1075_v9 = vld [vmem:[#allocation3 + $0xac0] sm:$0xff]  ;;  %v1076_v11 = vld [vmem:[#allocation3 + $0xac8] sm:$0xff] }
  0xc8   :  { %2805 = vmatprep.subr.bf16.mxu1 %v2804_v15  ;;  %v2854_v15 = vpack.c.bf16 %v1090_v2, %v1089_v62  ;;  %v2824_v16 = vpack.c.bf16 %v1076_v11, %v1075_v9  ;;  %v2872_v62 = vpack.c.bf16 %v1461_v56, %v1460_v4  ;;  %v1445_v2 = vld [vmem:[#allocation3 + $0xc08] sm:$0xff]  ;;  %v1476_v9 = vld [vmem:[#allocation3 + $0xd00] sm:$0xff] }
  0xc9   :  { %v1453_v4 = vld [vmem:[#allocation3 + $0xc48] sm:$0xff]  ;;  %v1484_v56 = vld [vmem:[#allocation3 + $0xd40] sm:$0xff] }
  0xca   :  { %2775 = vmatpush3.bf16.msra.mxu0 %v2774_v24  ;;  %v1077_v24 = vld [vmem:[#allocation3 + $0xad0] sm:$0xff] }
  0xcb   :  { %2807 = vmatpush3.bf16.msra.mxu1 %v2806_v26  ;;  %2809 = vmatprep.subr.bf16.mxu0 %v2808_v27  ;;  %v1078_v26 = vld [vmem:[#allocation3 + $0xad8] sm:$0xff]  ;;  %v1109_v27 = vld [vmem:[#allocation3 + $0xbd0] sm:$0xff] }
  0xcc   :  { %2841 = vmatprep.subr.bf16.mxu1 %v2840_v10  ;;  %v2828_v10 = vpack.c.bf16 %v1078_v26, %v1077_v24  ;;  %v2860_v33 = vpack.c.bf16 %v1110_v0, %v1109_v27  ;;  %v1446_v24 = vld [vmem:[#allocation3 + $0xc10] sm:$0xff]  ;;  %v1447_v26 = vld [vmem:[#allocation3 + $0xc18] sm:$0xff] }
  0xcd   :  { %1224 = vmatmul.mubr.f32.vlgmr.msra.gmra.mrb[8].mxu0 %v3206_v44  ;;  %v1073_v44 = vld [vmem:[#allocation3 + $0xab0] sm:$0xff] }
  0xce   :  { %1294 = vmatmul.mubr.f32.vlgmr.msra.gmra.mrb[8].mxu1 %v3209_v18  ;;  %2811 = vmatpush3.bf16.msra.mxu0 %v2810_v35  ;;  %v2818_v18 = vpack.c.bf16 %v1056_v50, %v1055_v19  ;;  %v2820_v59 = vpack.c.bf16 %v1074_v54, %v1073_v44  ;;  %v1079_v35 = vld [vmem:[#allocation3 + $0xae0] sm:$0xff]  ;;  %v2866_v19 = vpack.c.bf16 %v1096_v43, %v1095_v5  ;;  %v1098_v54 = vld [vmem:[#allocation3 + $0xb78] sm:$0xff]  ;;  %v1478_v27 = vld [vmem:[#allocation3 + $0xd10] sm:$0xff] }
  0xcf   :  { %2843 = vmatpush3.bf16.msra.mxu1 %v2842_v36  ;;  %2813 = vmatprep.subr.bf16.mxu0 %v2812_v37  ;;  %v1080_v36 = vld [vmem:[#allocation3 + $0xae8] sm:$0xff]  ;;  %v1111_v37 = vld [vmem:[#allocation3 + $0xbe0] sm:$0xff]  ;;  %v2870_v61 = vpack.c.bf16 %v1098_v54, %v1097_v53  ;;  %v1450_v43 = vld [vmem:[#allocation3 + $0xc30] sm:$0xff] }
  0xd0   :  { %2845 = vmatprep.subr.bf16.mxu1 %v2844_v40  ;;  %1363 = vmatprep.mubr.f32.mxu0 %v1149_v42  ;;  %v2832_v40 = vpack.c.bf16 %v1080_v36, %v1079_v35  ;;  %v2864_v42 = vpack.c.bf16 %v1112_v38, %v1111_v37  ;;  %v1448_v36 = vld [vmem:[#allocation3 + $0xc20] sm:$0xff]  ;;  %v1449_v37 = vld [vmem:[#allocation3 + $0xc28] sm:$0xff] }
  0xd1   :  { %1433 = vmatprep.mubr.f32.mxu1 %v1150_v46  ;;  %v1082_v46 = vld [vmem:[#allocation3 + $0xaf8] sm:$0xff]  ;;  %v1480_v38 = vld [vmem:[#allocation3 + $0xd20] sm:$0xff] }
  0xd2   :  { %2815 = vmatpush3.bf16.msra.mxu0 %v2814_v47  ;;  %v1113_v47 = vld [vmem:[#allocation3 + $0xbf0] sm:$0xff]  ;;  %v2836_v50 = vpack.c.bf16 %v1082_v46, %v1081_v45  ;;  %v1451_v45 = vld [vmem:[#allocation3 + $0xc38] sm:$0xff]  ;;  %v1452_v54 = vld [vmem:[#allocation3 + $0xc40] sm:$0xff] }
  0xd3   :  { %2847 = vmatpush3.bf16.msra.mxu1 %v2846_v48  ;;  %2817 = vmatprep.subr.bf16.mxu0 %v2816_v49  ;;  %v1114_v48 = vld [vmem:[#allocation3 + $0xbf8] sm:$0xff]  ;;  %v2834_v49 = vpack.c.bf16 %v1064_v25, %v1063_v41  ;;  %v1498_v41 = vld [vmem:[#allocation3 + $0xdb0] sm:$0xff] }
  0xd4   :  { %2849 = vmatprep.subr.bf16.mxu1 %v2848_v52  ;;  %v1066_v52 = vld [vmem:[#allocation3 + $0xa78] sm:$0xff]  ;;  %v2868_v44 = vpack.c.bf16 %v1114_v48, %v1113_v47  ;;  %v1482_v46 = vld [vmem:[#allocation3 + $0xd30] sm:$0xff] }
  0xd5   :  { %v2838_v60 = vpack.c.bf16 %v1066_v52, %v1065_v51  ;;  %v1499_v25 = vld [vmem:[#allocation3 + $0xdb8] sm:$0xff]  ;;  %v1501_v51 = vld [vmem:[#allocation3 + $0xdc8] sm:$0xff]  ;;  %v2886_v52 = vpack.c.bf16 %v1451_v45, %v1450_v43 }
  0xd6   :  { %2819 = vmatpush3.bf16.msra.mxu0 %v2818_v18  ;;  %v1492_v18 = vld [vmem:[#allocation3 + $0xd80] sm:$0xff]  ;;  %v2916_v47 = vpack.c.bf16 %v1499_v25, %v1498_v41  ;;  %v1483_v48 = vld [vmem:[#allocation3 + $0xd38] sm:$0xff]  ;;  %v1525_v41 = vld [vmem:[#allocation3 + $0xe88] sm:$0xff] }
  0xd7   :  { %2851 = vmatpush3.bf16.msra.mxu1 %v2850_v57  ;;  %2821 = vmatprep.subr.bf16.mxu0 %v2820_v59  ;;  %v1493_v57 = vld [vmem:[#allocation3 + $0xd88] sm:$0xff]  ;;  %v1574_v59 = vcombine.high %v3113_v6, %v3113_v6  ;;  %v2918_v53 = vpack.c.bf16 %v1483_v48, %v1482_v46  ;;  %v1556_v25 = vld [vmem:[#allocation3 + $0xf80] sm:$0xff] }
  0xd8   :  { %2853 = vmatprep.subr.bf16.mxu1 %v2852_v63  ;;  %v1444_v63 = vld [vmem:[#allocation3 + $0xc00] sm:$0xff]  ;;  %v2904_v11 = vpack.c.bf16 %v1493_v57, %v1492_v18  ;;  %v1485_v57 = vld [vmem:[#allocation3 + $0xd48] sm:$0xff] }
  0xd9   :  { %v3239_v58 = vrot.slane %v1574_v59, %v3145_v14  ;;  %v2874_v20 = vpack.c.bf16 %v1445_v2, %v1444_v63  ;;  %v1470_v59 = vld [vmem:[#allocation3 + $0xcd0] sm:$0xff]  ;;  %v2890_v63 = vpack.c.bf16 %v1453_v4, %v1452_v54  ;;  %v2922_v2 = vpack.c.bf16 %v1485_v57, %v1484_v56  ;;  %v1508_v46 = vld [vmem:[#allocation3 + $0xe00] sm:$0xff] }
  0xda   :  { %2823 = vmatpush3.bf16.msra.mxu0 %v2822_v55  ;;  %v1463_v55 = vld [vmem:[#allocation3 + $0xc98] sm:$0xff]  ;;  %v1540_v48 = vld [vmem:[#allocation3 + $0xf00] sm:$0xff]  ;;  %v1510_v57 = vld [vmem:[#allocation3 + $0xe10] sm:$0xff] }
  0xdb   :  { %2855 = vmatpush3.bf16.msra.mxu1 %v2854_v15  ;;  %2825 = vmatprep.subr.bf16.mxu0 %v2824_v16  ;;  %v3236_v15 = vrot.slane %v3113_v6, %v3145_v14  ;;  %v1494_v16 = vld [vmem:[#allocation3 + $0xd90] sm:$0xff]  ;;  %v2876_v23 = vpack.c.bf16 %v1463_v55, %v1462_v1  ;;  %v1465_v6 = vld [vmem:[#allocation3 + $0xca8] sm:$0xff]  ;;  %v1590_v32 = vcombine.high %v3239_v58, %v3239_v58 }
  0xdc   :  { %2857 = vmatprep.subr.bf16.mxu1 %v2856_v21  ;;  %v2906_v21 = vpack.c.bf16 %v1477_v12, %v1476_v9  ;;  %v2908_v0 = vpack.c.bf16 %v1495_v17, %v1494_v16  ;;  %v1455_v12 = vld [vmem:[#allocation3 + $0xc58] sm:$0xff]  ;;  %v1486_v1 = vld [vmem:[#allocation3 + $0xd50] sm:$0xff]  ;;  %v1472_v17 = vld [vmem:[#allocation3 + $0xce0] sm:$0xff] }
  0xdd   :  { %v1487_v16 = vld [vmem:[#allocation3 + $0xd58] sm:$0xff] }
  0xde   :  { %2827 = vmatpush3.bf16.msra.mxu0 %v2826_v28  ;;  %v1479_v28 = vld [vmem:[#allocation3 + $0xd18] sm:$0xff] }
  0xdf   :  { %2859 = vmatpush3.bf16.msra.mxu1 %v2858_v29  ;;  %2829 = vmatprep.subr.bf16.mxu0 %v2828_v10  ;;  %v1464_v29 = vld [vmem:[#allocation3 + $0xca0] sm:$0xff]  ;;  %v1589_v10 = vcombine.high %v3236_v15, %v3236_v15  ;;  %v2910_v34 = vpack.c.bf16 %v1479_v28, %v1478_v27  ;;  %v1457_v28 = vld [vmem:[#allocation3 + $0xc68] sm:$0xff] }
  0xe0   :  { %2861 = vmatprep.subr.bf16.mxu1 %v2860_v33  ;;  %v2878_v33 = vpack.c.bf16 %v1447_v26, %v1446_v24  ;;  %v2880_v35 = vpack.c.bf16 %v1465_v6, %v1464_v29  ;;  %v2926_v26 = vpack.c.bf16 %v1487_v16, %v1486_v1  ;;  %v1488_v29 = vld [vmem:[#allocation3 + $0xd60] sm:$0xff] }
  0xe1   :  { %v1512_v16 = vld [vmem:[#allocation3 + $0xe20] sm:$0xff] }
  0xe2   :  { %2831 = vmatpush3.bf16.msra.mxu0 %v2830_v22  ;;  %v2912_v22 = vpack.c.bf16 %v1497_v31, %v1496_v30  ;;  %v1474_v30 = vld [vmem:[#allocation3 + $0xcf0] sm:$0xff]  ;;  %v1475_v31 = vld [vmem:[#allocation3 + $0xcf8] sm:$0xff] }
  0xe3   :  { %2863 = vmatpush3.bf16.msra.mxu1 %v2862_v39  ;;  %2833 = vmatprep.subr.bf16.mxu0 %v2832_v40  ;;  %v1481_v39 = vld [vmem:[#allocation3 + $0xd28] sm:$0xff]  ;;  %v1467_v40 = vld [vmem:[#allocation3 + $0xcb8] sm:$0xff] }
  0xe4   :  { %2865 = vmatprep.subr.bf16.mxu1 %v2864_v42  ;;  %v2914_v5 = vpack.c.bf16 %v1481_v39, %v1480_v38  ;;  %v1459_v38 = vld [vmem:[#allocation3 + $0xc78] sm:$0xff] }
  0xe6   :  { %2835 = vmatpush3.bf16.msra.mxu0 %v2834_v49  ;;  %v1468_v49 = vld [vmem:[#allocation3 + $0xcc0] sm:$0xff] }
  0xe7   :  { %2867 = vmatpush3.bf16.msra.mxu1 %v2866_v19  ;;  %2837 = vmatprep.subr.bf16.mxu0 %v2836_v50  ;;  %v1469_v19 = vld [vmem:[#allocation3 + $0xcc8] sm:$0xff]  ;;  %v1500_v50 = vld [vmem:[#allocation3 + $0xdc0] sm:$0xff] }
  0xe8   :  { %2869 = vmatprep.subr.bf16.mxu1 %v2868_v44  ;;  %v2888_v44 = vpack.c.bf16 %v1469_v19, %v1468_v49  ;;  %v2920_v18 = vpack.c.bf16 %v1501_v51, %v1500_v50  ;;  %v1541_v19 = vld [vmem:[#allocation3 + $0xf08] sm:$0xff]  ;;  %v1526_v50 = vld [vmem:[#allocation3 + $0xe90] sm:$0xff]  ;;  %v1527_v51 = vld [vmem:[#allocation3 + $0xe98] sm:$0xff] }
  0xe9   :  { %v2970_v56 = vpack.c.bf16 %v1541_v19, %v1540_v48  ;;  %v1519_v48 = vld [vmem:[#allocation3 + $0xe58] sm:$0xff] }
  0xea   :  { %2839 = vmatpush3.bf16.msra.mxu0 %v2838_v60  ;;  %v1471_v60 = vld [vmem:[#allocation3 + $0xcd8] sm:$0xff] }
  0xeb   :  { %2871 = vmatpush3.bf16.msra.mxu1 %v2870_v61  ;;  %2873 = vmatprep.subr.bf16.mxu0 %v2872_v62  ;;  %v1502_v61 = vld [vmem:[#allocation3 + $0xdd0] sm:$0xff]  ;;  %v1503_v62 = vld [vmem:[#allocation3 + $0xdd8] sm:$0xff]  ;;  %v2892_v9 = vpack.c.bf16 %v1471_v60, %v1470_v59 }
  0xec   :  { %2905 = vmatprep.subr.bf16.mxu1 %v2904_v11  ;;  %v1454_v11 = vld [vmem:[#allocation3 + $0xc50] sm:$0xff]  ;;  %v2924_v55 = vpack.c.bf16 %v1503_v62, %v1502_v61  ;;  %v1511_v59 = vld [vmem:[#allocation3 + $0xe18] sm:$0xff] }
  0xed   :  { %1364 = vmatmul.mubr.f32.vlgmr.msra.gmra.mrb[10].mxu0 %v3221_v13  ;;  %v1466_v13 = vld [vmem:[#allocation3 + $0xcb0] sm:$0xff]  ;;  %v2894_v24 = vpack.c.bf16 %v1455_v12, %v1454_v11  ;;  %v1543_v62 = vld [vmem:[#allocation3 + $0xf18] sm:$0xff]  ;;  %v2942_v12 = vpack.c.bf16 %v1511_v59, %v1510_v57  ;;  %v1520_v59 = vld [vmem:[#allocation3 + $0xe60] sm:$0xff] }
  0xee   :  { %1434 = vmatmul.mubr.f32.vlgmr.msra.gmra.mrb[10].mxu1 %v3224_v3  ;;  %2875 = vmatpush3.bf16.msra.mxu0 %v2874_v20  ;;  %v2882_v3 = vpack.c.bf16 %v1449_v37, %v1448_v36  ;;  %v2884_v42 = vpack.c.bf16 %v1467_v40, %v1466_v13  ;;  %v1473_v20 = vld [vmem:[#allocation3 + $0xce8] sm:$0xff]  ;;  %v2900_v36 = vpack.c.bf16 %v1475_v31, %v1474_v30  ;;  %v1458_v37 = vld [vmem:[#allocation3 + $0xc70] sm:$0xff]  ;;  %v1491_v13 = vld [vmem:[#allocation3 + $0xd78] sm:$0xff] }
  0xef   :  { %2907 = vmatpush3.bf16.msra.mxu1 %v2906_v21  ;;  %2877 = vmatprep.subr.bf16.mxu0 %v2876_v23  ;;  %v1504_v21 = vld [vmem:[#allocation3 + $0xde0] sm:$0xff]  ;;  %v1505_v23 = vld [vmem:[#allocation3 + $0xde8] sm:$0xff]  ;;  %v2896_v27 = vpack.c.bf16 %v1473_v20, %v1472_v17  ;;  %v1542_v60 = vld [vmem:[#allocation3 + $0xf10] sm:$0xff] }
  0xf0   :  { %2909 = vmatprep.subr.bf16.mxu1 %v2908_v0  ;;  %1680 = vmatprep.mubr.f32.mxu0 %v1589_v10  ;;  %v1456_v0 = vld [vmem:[#allocation3 + $0xc60] sm:$0xff]  ;;  %v2928_v6 = vpack.c.bf16 %v1505_v23, %v1504_v21  ;;  %v1489_v10 = vld [vmem:[#allocation3 + $0xd68] sm:$0xff]  ;;  %v2974_v1 = vpack.c.bf16 %v1543_v62, %v1542_v60  ;;  %v1547_v31 = vld [vmem:[#allocation3 + $0xf38] sm:$0xff] }
  0xf1   :  { %1750 = vmatprep.mubr.f32.mxu1 %v1590_v32  ;;  %v1506_v32 = vld [vmem:[#allocation3 + $0xdf0] sm:$0xff]  ;;  %v1524_v40 = vld [vmem:[#allocation3 + $0xe80] sm:$0xff]  ;;  %v1513_v17 = vld [vmem:[#allocation3 + $0xe28] sm:$0xff] }
  0xf2   :  { %2879 = vmatpush3.bf16.msra.mxu0 %v2878_v33  ;;  %v1507_v33 = vld [vmem:[#allocation3 + $0xdf8] sm:$0xff]  ;;  %v2936_v45 = vpack.c.bf16 %v1525_v41, %v1524_v40  ;;  %v1544_v20 = vld [vmem:[#allocation3 + $0xf20] sm:$0xff]  ;;  %v1545_v23 = vld [vmem:[#allocation3 + $0xf28] sm:$0xff] }
  0xf3   :  { %2911 = vmatpush3.bf16.msra.mxu1 %v2910_v34  ;;  %2881 = vmatprep.subr.bf16.mxu0 %v2880_v35  ;;  %v2898_v34 = vpack.c.bf16 %v1457_v28, %v1456_v0  ;;  %v2930_v35 = vpack.c.bf16 %v1489_v10, %v1488_v29  ;;  %v2932_v39 = vpack.c.bf16 %v1507_v33, %v1506_v32  ;;  %v1514_v29 = vld [vmem:[#allocation3 + $0xe30] sm:$0xff]  ;;  %v1532_v32 = vld [vmem:[#allocation3 + $0xec0] sm:$0xff]  ;;  %v1533_v33 = vld [vmem:[#allocation3 + $0xec8] sm:$0xff] }
  0xf4   :  { %2913 = vmatprep.subr.bf16.mxu1 %v2912_v22  ;;  %v1490_v22 = vld [vmem:[#allocation3 + $0xd70] sm:$0xff]  ;;  %v2978_v0 = vpack.c.bf16 %v1545_v23, %v1544_v20  ;;  %v1549_v41 = vld [vmem:[#allocation3 + $0xf48] sm:$0xff] }
  0xf5   :  { %v2934_v43 = vpack.c.bf16 %v1491_v13, %v1490_v22  ;;  %v1546_v10 = vld [vmem:[#allocation3 + $0xf30] sm:$0xff]  ;;  %v1516_v22 = vld [vmem:[#allocation3 + $0xe40] sm:$0xff]  ;;  %v1521_v60 = vld [vmem:[#allocation3 + $0xe68] sm:$0xff] }
  0xf6   :  { %2883 = vmatpush3.bf16.msra.mxu0 %v2882_v3  ;;  %v1557_v3 = vld [vmem:[#allocation3 + $0xf88] sm:$0xff]  ;;  %v1548_v13 = vld [vmem:[#allocation3 + $0xf40] sm:$0xff] }
  0xf7   :  { %2915 = vmatpush3.bf16.msra.mxu1 %v2914_v5  ;;  %2885 = vmatprep.subr.bf16.mxu0 %v2884_v42  ;;  %v1591_v5 = vcombine.high %v3118_v7, %v3118_v7  ;;  %v2902_v42 = vpack.c.bf16 %v1459_v38, %v1458_v37  ;;  %v2968_v49 = vpack.c.bf16 %v1557_v3, %v1556_v25  ;;  %v1534_v25 = vld [vmem:[#allocation3 + $0xed0] sm:$0xff]  ;;  %v1535_v3 = vld [vmem:[#allocation3 + $0xed8] sm:$0xff] }
  0xf8   :  { %2917 = vmatprep.subr.bf16.mxu1 %v2916_v47  ;;  %v1509_v47 = vld [vmem:[#allocation3 + $0xe08] sm:$0xff]  ;;  %v2982_v37 = vpack.c.bf16 %v1547_v31, %v1546_v10  ;;  %v2952_v38 = vpack.c.bf16 %v1533_v33, %v1532_v32 }
  0xf9   :  { %v3254_v54 = vrot.slane %v1591_v5, %v3145_v14  ;;  %v2938_v4 = vpack.c.bf16 %v1509_v47, %v1508_v46  ;;  %v1566_v5 = vld [vmem:[#allocation3 + $0xfd0] sm:$0xff]  ;;  %v2956_v46 = vpack.c.bf16 %v1535_v3, %v1534_v25 }
  0xfa   :  { %2887 = vmatpush3.bf16.msra.mxu0 %v2886_v52  ;;  %v3251_v52 = vrot.slane %v3118_v7, %v3145_v14  ;;  %v1529_v7 = vld [vmem:[#allocation3 + $0xea8] sm:$0xff]  ;;  %v1560_v14 = vld [vmem:[#allocation3 + $0xfa0] sm:$0xff]  ;;  %v1518_v47 = vld [vmem:[#allocation3 + $0xe50] sm:$0xff] }
  0xfb   :  { %2919 = vmatpush3.bf16.msra.mxu1 %v2918_v53  ;;  %2889 = vmatprep.subr.bf16.mxu0 %v2888_v44  ;;  %v1558_v53 = vld [vmem:[#allocation3 + $0xf90] sm:$0xff]  ;;  %v1559_v44 = vld [vmem:[#allocation3 + $0xf98] sm:$0xff]  ;;  %v1607_v11 = vcombine.high %v3254_v54, %v3254_v54 }
  0xfc   :  { %2921 = vmatprep.subr.bf16.mxu1 %v2920_v18  ;;  %v2940_v18 = vpack.c.bf16 %v1527_v51, %v1526_v50  ;;  %v2972_v61 = vpack.c.bf16 %v1559_v44, %v1558_v53  ;;  %v1551_v50 = vld [vmem:[#allocation3 + $0xf58] sm:$0xff]  ;;  %v1536_v51 = vld [vmem:[#allocation3 + $0xee0] sm:$0xff]  ;;  %v1537_v53 = vld [vmem:[#allocation3 + $0xee8] sm:$0xff] }
  0xfd   :  { %v1568_v44 = vld [vmem:[#allocation3 + $0xfe0] sm:$0xff]  ;;  %v2960_v57 = vpack.c.bf16 %v1537_v53, %v1536_v51 }
  0xfe   :  { %2891 = vmatpush3.bf16.msra.mxu0 %v2890_v63  ;;  %v1528_v63 = vld [vmem:[#allocation3 + $0xea0] sm:$0xff] }
  0xff   :  { %2923 = vmatpush3.bf16.msra.mxu1 %v2922_v2  ;;  %2893 = vmatprep.subr.bf16.mxu0 %v2892_v9  ;;  %v1606_v2 = vcombine.high %v3251_v52, %v3251_v52  ;;  %v1561_v9 = vld [vmem:[#allocation3 + $0xfa8] sm:$0xff] }
 0x100   :  { %2925 = vmatprep.subr.bf16.mxu1 %v2924_v55  ;;  %v2944_v55 = vpack.c.bf16 %v1529_v7, %v1528_v63  ;;  %v2976_v21 = vpack.c.bf16 %v1561_v9, %v1560_v14  ;;  %v1553_v7 = vld [vmem:[#allocation3 + $0xf68] sm:$0xff]  ;;  %v1539_v14 = vld [vmem:[#allocation3 + $0xef8] sm:$0xff] }
 0x102   :  { %2895 = vmatpush3.bf16.msra.mxu0 %v2894_v24  ;;  %v1531_v24 = vld [vmem:[#allocation3 + $0xeb8] sm:$0xff] }
 0x103   :  { %2927 = vmatpush3.bf16.msra.mxu1 %v2926_v26  ;;  %2897 = vmatprep.subr.bf16.mxu0 %v2896_v27  ;;  %v1562_v26 = vld [vmem:[#allocation3 + $0xfb0] sm:$0xff]  ;;  %v1563_v27 = vld [vmem:[#allocation3 + $0xfb8] sm:$0xff] }
 0x104   :  { %2929 = vmatprep.subr.bf16.mxu1 %v2928_v6  ;;  %v1515_v6 = vld [vmem:[#allocation3 + $0xe38] sm:$0xff]  ;;  %v2980_v30 = vpack.c.bf16 %v1563_v27, %v1562_v26  ;;  %v1554_v27 = vld [vmem:[#allocation3 + $0xf70] sm:$0xff] }
 0x106   :  { %2899 = vmatpush3.bf16.msra.mxu0 %v2898_v34  ;;  %v1564_v34 = vld [vmem:[#allocation3 + $0xfc0] sm:$0xff] }
 0x107   :  { %2931 = vmatpush3.bf16.msra.mxu1 %v2930_v35  ;;  %2901 = vmatprep.subr.bf16.mxu0 %v2900_v36  ;;  %v1565_v35 = vld [vmem:[#allocation3 + $0xfc8] sm:$0xff]  ;;  %v2950_v36 = vpack.c.bf16 %v1515_v6, %v1514_v29 }
 0x108   :  { %2933 = vmatprep.subr.bf16.mxu1 %v2932_v39  ;;  %v1517_v39 = vld [vmem:[#allocation3 + $0xe48] sm:$0xff]  ;;  %v2984_v40 = vpack.c.bf16 %v1565_v35, %v1564_v34 }
 0x10a   :  { %2903 = vmatpush3.bf16.msra.mxu0 %v2902_v42  ;;  %v1567_v42 = vld [vmem:[#allocation3 + $0xfd8] sm:$0xff] }
 0x10b   :  { %2935 = vmatpush3.bf16.msra.mxu1 %v2934_v43  ;;  %2937 = vmatprep.subr.bf16.mxu0 %v2936_v45  ;;  %v2954_v43 = vpack.c.bf16 %v1517_v39, %v1516_v22  ;;  %v2986_v45 = vpack.c.bf16 %v1549_v41, %v1548_v13  ;;  %v2988_v19 = vpack.c.bf16 %v1567_v42, %v1566_v5 }
 0x10c   :  { %2969 = vmatprep.subr.bf16.mxu1 %v2968_v49  ;;  %v1550_v49 = vld [vmem:[#allocation3 + $0xf50] sm:$0xff] }
 0x10d   :  { %1681 = vmatmul.mubr.f32.vlgmr.msra.gmra.mrb[12].mxu0 %v3236_v15  ;;  %v1530_v15 = vld [vmem:[#allocation3 + $0xeb0] sm:$0xff] }
 0x10e   :  { %1751 = vmatmul.mubr.f32.vlgmr.msra.gmra.mrb[12].mxu1 %v3239_v58  ;;  %2939 = vmatpush3.bf16.msra.mxu0 %v2938_v4  ;;  %v2946_v58 = vpack.c.bf16 %v1513_v17, %v1512_v16  ;;  %v2948_v28 = vpack.c.bf16 %v1531_v24, %v1530_v15  ;;  %v1569_v4 = vld [vmem:[#allocation3 + $0xfe8] sm:$0xff]  ;;  %v2962_v17 = vpack.c.bf16 %v1521_v60, %v1520_v59  ;;  %v1522_v15 = vld [vmem:[#allocation3 + $0xe70] sm:$0xff]  ;;  %v1523_v24 = vld [vmem:[#allocation3 + $0xe78] sm:$0xff] }
 0x10f   :  { %2971 = vmatpush3.bf16.msra.mxu1 %v2970_v56  ;;  %2941 = vmatprep.subr.bf16.mxu0 %v2940_v18  ;;  %v2958_v56 = vpack.c.bf16 %v1519_v48, %v1518_v47  ;;  %v2990_v18 = vpack.c.bf16 %v1551_v50, %v1550_v49  ;;  %v2992_v63 = vpack.c.bf16 %v1569_v4, %v1568_v44 }
 0x110   :  { %2973 = vmatprep.subr.bf16.mxu1 %v2972_v61  ;;  %1820 = vmatprep.mubr.f32.mxu0 %v1606_v2  ;;  %v1552_v61 = vld [vmem:[#allocation3 + $0xf60] sm:$0xff]  ;;  %v1538_v2 = vld [vmem:[#allocation3 + $0xef0] sm:$0xff] }
 0x111   :  { %1890 = vmatprep.mubr.f32.mxu1 %v1607_v11  ;;  %v2964_v23 = vpack.c.bf16 %v1539_v14, %v1538_v2 }
 0x112   :  { %2943 = vmatpush3.bf16.msra.mxu0 %v2942_v12  ;;  %v1570_v12 = vld [vmem:[#allocation3 + $0xff0] sm:$0xff] }
 0x113   :  { %2975 = vmatpush3.bf16.msra.mxu1 %v2974_v1  ;;  %2945 = vmatprep.subr.bf16.mxu0 %v2944_v55  ;;  %v1571_v1 = vld [vmem:[#allocation3 + $0xff8] sm:$0xff] }
 0x114   :  { %2977 = vmatprep.subr.bf16.mxu1 %v2976_v21  ;;  %v2994_v21 = vpack.c.bf16 %v1553_v7, %v1552_v61  ;;  %v2996_v26 = vpack.c.bf16 %v1571_v1, %v1570_v12 }
 0x116   :  { %2947 = vmatpush3.bf16.msra.mxu0 %v2946_v58  ;;  %v1555_v58 = vld [vmem:[#allocation3 + $0xf78] sm:$0xff] }
 0x117   :  { %2979 = vmatpush3.bf16.msra.mxu1 %v2978_v0  ;;  %2949 = vmatprep.subr.bf16.mxu0 %v2948_v28  ;;  %v2966_v28 = vpack.c.bf16 %v1523_v24, %v1522_v15  ;;  %v2998_v29 = vpack.c.bf16 %v1555_v58, %v1554_v27  ;;  %v1926_v15 = vld [vmem:[#allocation5] ss:$0 sm:$0xff] }
 0x118   :  { %2981 = vmatprep.subr.bf16.mxu1 %v2980_v30 }
 0x11a   :  { %2951 = vmatpush3.bf16.msra.mxu0 %v2950_v36 }
 0x11b   :  { %2983 = vmatpush3.bf16.msra.mxu1 %v2982_v37  ;;  %2953 = vmatprep.subr.bf16.mxu0 %v2952_v38 }
 0x11c   :  { %2985 = vmatprep.subr.bf16.mxu1 %v2984_v40 }
 0x11e   :  { %2955 = vmatpush3.bf16.msra.mxu0 %v2954_v43 }
 0x11f   :  { %2987 = vmatpush3.bf16.msra.mxu1 %v2986_v45  ;;  %2957 = vmatprep.subr.bf16.mxu0 %v2956_v46 }
 0x120   :  { %v1960_v62 = vpop.f32.mrb[0].mxu0  ;;  %2989 = vmatprep.subr.bf16.mxu1 %v2988_v19 }
 0x121   :  { %v1995_v9 = vpop.f32.mrb[0].mxu1  ;;  %v1961_v11 = vpop.f32.mrb[1].mxu0 }
 0x122   :  { %v1962_v55 = vadd.f32 %v1961_v11, %v1960_v62  ;;  %v1996_v16 = vpop.f32.mrb[1].mxu1  ;;  %2959 = vmatpush3.bf16.msra.mxu0 %v2958_v56 }
 0x123   :  { %v1997_v20 = vadd.f32 %v1996_v16, %v1995_v9  ;;  %2991 = vmatpush3.bf16.msra.mxu1 %v2990_v18  ;;  %2961 = vmatprep.subr.bf16.mxu0 %v2960_v57 }
 0x124   :  { %2993 = vmatprep.subr.bf16.mxu1 %v2992_v63 }
 0x125   :  { %v516_v0 = vadd.f32 %v1997_v20, %v1962_v55 }
 0x126   :  { %2963 = vmatpush3.bf16.msra.mxu0 %v2962_v17 }
 0x127   :  { %2995 = vmatpush3.bf16.msra.mxu1 %v2994_v21  ;;  %2965 = vmatprep.subr.bf16.mxu0 %v2964_v23 }
 0x128   :  { %2997 = vmatprep.subr.bf16.mxu1 %v2996_v26 }
 0x12a   :  { %2967 = vmatpush3.bf16.msra.mxu0 %v2966_v28  ;;  %v1906_v28 = vand.u32 127, %v341_v8 }
 0x12b   :  { %2999 = vmatpush3.bf16.msra.mxu1 %v2998_v29 }
 0x12c   :  { %vm1907_vm0 = vcmp.lt.s32.totalorder %v1906_v28, 5 }
 0x12d   :  { %1821 = vmatmul.mubr.f32.vlgmr.msra.gmra.mrb[14].mxu0 %v3251_v52 }
 0x12e   :  { %1891 = vmatmul.mubr.f32.vlgmr.msra.gmra.mrb[14].mxu1 %v3254_v54 }
 0x140   :  { %v2030_v6 = vpop.f32.mrb[2].mxu0 }
 0x141   :  { %v2031_v10 = vpop.f32.mrb[3].mxu0  ;;  %v2065_v30 = vpop.f32.mrb[2].mxu1 }
 0x142   :  { %v2032_v31 = vadd.f32 %v2031_v10, %v2030_v6  ;;  %v2066_v32 = vpop.f32.mrb[3].mxu1 }
 0x143   :  { %v2067_v33 = vadd.f32 %v2066_v32, %v2065_v30 }
 0x144   :  { %v586_v34 = vadd.f32 %v2032_v31, %v516_v0 }
 0x146   :  { %v656_v35 = vadd.f32 %v2067_v33, %v586_v34 }
 0x160   :  { %v2100_v36 = vpop.f32.mrb[4].mxu0 }
 0x161   :  { %v2101_v37 = vpop.f32.mrb[5].mxu0  ;;  %v2135_v38 = vpop.f32.mrb[4].mxu1 }
 0x162   :  { %v2102_v22 = vadd.f32 %v2101_v37, %v2100_v36  ;;  %v2136_v39 = vpop.f32.mrb[5].mxu1 }
 0x163   :  { %v2137_v13 = vadd.f32 %v2136_v39, %v2135_v38 }
 0x164   :  { %v770_v40 = vadd.f32 %v2102_v22, %v656_v35 }
 0x166   :  { %v840_v41 = vadd.f32 %v2137_v13, %v770_v40 }
 0x180   :  { %v2170_v25 = vpop.f32.mrb[6].mxu0 }
 0x181   :  { %v2171_v52 = vpop.f32.mrb[7].mxu0  ;;  %v2205_v3 = vpop.f32.mrb[6].mxu1 }
 0x182   :  { %v2172_v54 = vadd.f32 %v2171_v52, %v2170_v25  ;;  %v2206_v5 = vpop.f32.mrb[7].mxu1 }
 0x183   :  { %v2207_v42 = vadd.f32 %v2206_v5, %v2205_v3 }
 0x184   :  { %v910_v43 = vadd.f32 %v2172_v54, %v840_v41 }
 0x186   :  { %v980_v45 = vadd.f32 %v2207_v42, %v910_v43 }
 0x1a0   :  { %v2240_v46 = vpop.f32.mrb[8].mxu0 }
 0x1a1   :  { %v2275_v47 = vpop.f32.mrb[8].mxu1  ;;  %v2241_v48 = vpop.f32.mrb[9].mxu0 }
 0x1a2   :  { %v2242_v49 = vadd.f32 %v2241_v48, %v2240_v46  ;;  %v2276_v19 = vpop.f32.mrb[9].mxu1 }
 0x1a3   :  { %v2277_v50 = vadd.f32 %v2276_v19, %v2275_v47 }
 0x1a5   :  { %v1296_v51 = vadd.f32 %v2277_v50, %v2242_v49 }
 0x1c0   :  { %v2310_v53 = vpop.f32.mrb[10].mxu0 }
 0x1c1   :  { %v2311_v44 = vpop.f32.mrb[11].mxu0  ;;  %v2345_v4 = vpop.f32.mrb[10].mxu1 }
 0x1c2   :  { %v2312_v56 = vadd.f32 %v2311_v44, %v2310_v53  ;;  %v2346_v18 = vpop.f32.mrb[11].mxu1 }
 0x1c3   :  { %v2347_v57 = vadd.f32 %v2346_v18, %v2345_v4 }
 0x1c4   :  { %v1366_v59 = vadd.f32 %v2312_v56, %v1296_v51 }
 0x1c6   :  { %v1436_v60 = vadd.f32 %v2347_v57, %v1366_v59 }
 0x1c8   :  { %v1439_v61 = vadd.f32 %v1436_v60, %v980_v45 }
 0x1e0   :  { %v2380_v62 = vpop.f32.mrb[12].mxu0 }
 0x1e1   :  { %v2415_v63 = vpop.f32.mrb[12].mxu1  ;;  %v2381_v7 = vpop.f32.mrb[13].mxu0 }
 0x1e2   :  { %v2382_v2 = vadd.f32 %v2381_v7, %v2380_v62  ;;  %v2416_v14 = vpop.f32.mrb[13].mxu1 }
 0x1e3   :  { %v2417_v9 = vadd.f32 %v2416_v14, %v2415_v63 }
 0x1e5   :  { %v1753_v11 = vadd.f32 %v2417_v9, %v2382_v2 }
 0x200   :  { %v2450_v12 = vpop.f32.mrb[14].mxu0 }
 0x201   :  { %v2451_v1 = vpop.f32.mrb[15].mxu0  ;;  %v2485_v55 = vpop.f32.mrb[14].mxu1 }
 0x202   :  { %v2452_v16 = vadd.f32 %v2451_v1, %v2450_v12  ;;  %v2486_v17 = vpop.f32.mrb[15].mxu1 }
 0x203   :  { %v2487_v20 = vadd.f32 %v2486_v17, %v2485_v55 }
 0x204   :  { %v1823_v21 = vadd.f32 %v2452_v16, %v1753_v11 }
 0x206   :  { %v1893_v23 = vadd.f32 %v2487_v20, %v1823_v21 }
 0x208   :  { %v1896_v24 = vadd.f32 %v1893_v23, %v1439_v61 }
 0x20a   :  { %v1904_v26 = vadd.f32 %v1926_v15, %v1896_v24 }
 0x20c   :  { %v1927_v27 = vmul.f32 -1.442695, %v1904_v26 }
 0x20e   :  { %3005 = vpow2.f32 %v1927_v27 }
 0x218   :  { %v3006_v58 = vpop.eup %3005 }
 0x219   :  { %v1911_v0 = vadd.f32 1.0, %v3006_v58 }
 0x21b   :  { %3007 = vrcp.f32 %v1911_v0 }
 0x225   :  { %v3008_v29 = vpop.eup %3007 }
 0x226   :  { %v1914_v6 = vsel %vm1907_vm0, %v3008_v29, %v1904_v26 }
 0x227   :  { %1915 = vst [vmem:[%s3271_s3] sm:$0x3] %v1914_v6 }
 0x228   :  { %1920 = vsyncpa [#allocation4], 1 }
 0x229   :  { %1921 = vsyncpa [#allocation6], 1 }

</bundles_post_ra>
